<compile_context>
chip_gen: v5e
topology: v5e:2x2
jax: 0.10.0
libtpu: 0.0.40
codegen_flags: <defaults>
</compile_context>

<pallas_src>
import functools

import jax
import jax.numpy as jnp
from jax.experimental import pallas as pl
from jax.experimental.pallas import tpu as pltpu

K_SIZE = 5
PAD = 2
LANE = 128
KD_ALIGN = 16          # bf16 packs 2 rows per sublane -> contraction dim % 16 == 0

# Sub-pixel decomposition of a stride-2, padding-2, output_padding-1
# ConvTranspose2d: per output parity, the kernel-tap indices (in stride-1 conv
# tap order t = 0..T-1) and the (lo, hi) padding of the undilated input.
#   even outputs: taps kh = [4, 2, 0], input pad (1, 1)
#   odd  outputs: taps kh = [3, 1],    input pad (0, 1)
_PARITY_TAPS = {0: ((4, 2, 0), (1, 1)), 1: ((3, 1), (0, 1))}
_FULL_TAPS = (4, 3, 2, 1, 0)   # stride-1 tconv == stride-1 conv w/ flipped kernel


def _round_up(x, m):
    return (x + m - 1) // m * m


def _tpu_budget():
    """Per-generation (M-tile, scoped-VMEM) budget.

    v5e / v6e have 128 MiB VMEM -> big M tiles & a roomy scoped limit;
    v7x only has 64 MiB -> keep tiles and the scoped limit conservative."""
    try:
        vmem = int(pltpu.get_tpu_info().vmem_capacity_bytes)
    except Exception:
        vmem = 64 * 1024 * 1024
    if vmem >= 96 * 1024 * 1024:            # v5e / v6e (128 MiB)
        return 2048, 64 * 1024 * 1024
    return 1024, 32 * 1024 * 1024            # v7x (64 MiB total VMEM)


MAX_TILE_M, VMEM_LIMIT = _tpu_budget()


def _pick_tile_m(m):
    """Pick the M tile: a full-dim block for small M, otherwise a lane-multiple
    capped so there are >= 2 M grid steps (lets v7x's two TCs split the work)."""
    if m < 256:
        return m
    tile = min(m, MAX_TILE_M, max(LANE, _round_up((m + 1) // 2, LANE)))
    if m % tile:
        for cand in range(tile, LANE - 1, -LANE):   # prefer no column padding
            if m % cand == 0:
                return cand
    return tile


# --------------------------------------------------------------------------
# Pallas kernels
# --------------------------------------------------------------------------
def _gemm_act_kernel(w_ref, a_ref, b_ref, alpha_ref, *rest, act, fuse_add):
    """o = act(W @ A + b) [+ noise].  W:[Co,Kd] bf16, A:[Kd,TM] bf16, f32 acc."""
    if fuse_add:
        n_ref, o_ref = rest
    else:
        (o_ref,) = rest
    acc = jnp.dot(w_ref[...], a_ref[...], preferred_element_type=jnp.float32)
    acc = acc + b_ref[...]                        # [Co,1] broadcast over lanes
    if act == "prelu":
        alpha = alpha_ref[0]                      # scalar from SMEM
        acc = jnp.where(acc >= 0.0, acc, alpha * acc)
    elif act == "sigmoid":
        acc = jax.nn.sigmoid(acc)
    if fuse_add:
        acc = acc + n_ref[...]                    # fused AWGN channel add (f32)
    o_ref[...] = acc.astype(o_ref.dtype)


def gemm_act(w, a, bias, alpha, act, tile_m, noise=None, out_dtype=jnp.bfloat16):
    """out[g, Co, M] = act(w[g] @ a[g] + bias) (+ noise).

    g is a fused-group axis (1 for plain convs, 4 for the tconv parities).
    Weights / bias stay resident per group (constant index maps), patches
    stream over M, MXU runs bf16 with f32 accumulation.
    """
    g, co, kd_p = w.shape
    _, _, m_p = a.shape
    grid = (g, m_p // tile_m)
    fuse_add = noise is not None

    inputs = [w, a, bias, alpha]
    in_specs = [
        pl.BlockSpec((None, co, kd_p), lambda p, j: (p, 0, 0)),       # resident weight
        pl.BlockSpec((None, kd_p, tile_m), lambda p, j: (p, 0, j)),   # streamed patches
        pl.BlockSpec((co, 1), lambda p, j: (0, 0)),                   # resident bias
        pl.BlockSpec(memory_space=pltpu.MemorySpace.SMEM),            # PReLU alpha
    ]
    if fuse_add:
        inputs.append(noise)
        in_specs.append(pl.BlockSpec((None, co, tile_m), lambda p, j: (0, 0, j)))

    out_bytes = g * co * m_p * jnp.dtype(out_dtype).itemsize
    cost = pl.CostEstimate(
        flops=2 * g * co * kd_p * m_p,
        transcendentals=(g * co * m_p) if act == "sigmoid" else 0,
        bytes_accessed=w.size * 2 + a.size * 2 + out_bytes
        + (noise.size * 4 if fuse_add else 0),
    )

    # TODO(synk): if an xprof trace at scale shows exposed DMA per M step,
    # add pipeline_mode=pl.Buffered(3) to the patch BlockSpec (only pays off
    # once there are > 2 M grid steps).
    return pl.pallas_call(
        functools.partial(_gemm_act_kernel, act=act, fuse_add=fuse_add),
        out_shape=jax.ShapeDtypeStruct((g, co, m_p), out_dtype),
        grid=grid,
        in_specs=in_specs,
        out_specs=pl.BlockSpec((None, co, tile_m), lambda p, j: (p, 0, j)),
        compiler_params=pltpu.CompilerParams(
            dimension_semantics=("parallel", "parallel"),
            vmem_limit_bytes=VMEM_LIMIT),
        cost_estimate=cost,
    )(*inputs)


def _scale_add_kernel(x_ref, s_ref, n_ref, o_ref):
    o_ref[...] = (x_ref[...] * s_ref[...] + n_ref[...]).astype(o_ref.dtype)


def scale_add(x, scale_cols, noise, out_dtype=jnp.bfloat16):
    """out = x * scale + noise on channel-major [C, M] tensors ('paper' path)."""
    c, m = x.shape
    tile_m = _pick_tile_m(m)
    m_p = _round_up(m, tile_m)
    if m_p > m:
        pad = ((0, 0), (0, m_p - m))
        x, noise, scale_cols = (jnp.pad(x, pad), jnp.pad(noise, pad),
                                jnp.pad(scale_cols, pad))
    out = pl.pallas_call(
        _scale_add_kernel,
        out_shape=jax.ShapeDtypeStruct((c, m_p), out_dtype),
        grid=(m_p // tile_m,),
        in_specs=[pl.BlockSpec((c, tile_m), lambda j: (0, j)),
                  pl.BlockSpec((1, tile_m), lambda j: (0, j)),
                  pl.BlockSpec((c, tile_m), lambda j: (0, j))],
        out_specs=pl.BlockSpec((c, tile_m), lambda j: (0, j)),
        compiler_params=pltpu.CompilerParams(
            dimension_semantics=("parallel",), vmem_limit_bytes=VMEM_LIMIT),
    )(x, scale_cols, noise)
    return out[:, :m]


# --------------------------------------------------------------------------
# Conv / ConvTranspose wrappers (im2col glue in JAX, GEMM hot path in Pallas)
# --------------------------------------------------------------------------
def _patches(xp, n_taps_h, n_taps_w, ho, wo, stride, kd_total, m_total):
    """xp: padded input [Cin, N, Hp, Wp] (bf16).  Returns the im2col matrix
    [kd_total, m_total]; rows ordered (tap_h, tap_w, cin), columns (n, oh, ow).
    Zero rows for Kd alignment are appended inside the single concatenate that
    materializes the matrix (no separate pad pass over the big tensor)."""
    cin, n = xp.shape[0], xp.shape[1]
    m = n * ho * wo
    slabs = []
    for th in range(n_taps_h):
        for tw in range(n_taps_w):
            s = xp[:, :, th: th + (ho - 1) * stride + 1: stride,
                         tw: tw + (wo - 1) * stride + 1: stride]
            slabs.append(s.reshape(cin, m))
    kd = len(slabs) * cin
    if kd_total > kd:
        slabs.append(jnp.zeros((kd_total - kd, m), xp.dtype))
    a = jnp.concatenate(slabs, axis=0)
    if m_total > m:                                   # only for ragged M tiles
        a = jnp.pad(a, ((0, 0), (0, m_total - m)))
    return a


def conv2d(x, w, bias, alpha, stride, act, noise=None, out_dtype=jnp.bfloat16):
    """x: [Cin, N, H, W]; w: [1, Co, Kd_p] bf16 (rows (kh, kw, cin), pre-padded)."""
    cin, n, h, wid = x.shape
    ho = (h + 2 * PAD - K_SIZE) // stride + 1
    wo = (wid + 2 * PAD - K_SIZE) // stride + 1
    m = n * ho * wo
    tile_m = _pick_tile_m(m)
    m_p = _round_up(m, tile_m)
    kd_p = w.shape[-1]

    xp = jnp.pad(x.astype(jnp.bfloat16), ((0, 0), (0, 0), (PAD, PAD), (PAD, PAD)))
    a = _patches(xp, K_SIZE, K_SIZE, ho, wo, stride, kd_p, m_p)[None]

    noise_m = None
    if noise is not None:
        noise_m = noise.reshape(noise.shape[0], -1).astype(jnp.float32)
        if m_p > m:
            noise_m = jnp.pad(noise_m, ((0, 0), (0, m_p - m)))
        noise_m = noise_m[None]

    out = gemm_act(w, a, bias, alpha, act, tile_m, noise=noise_m,
                   out_dtype=out_dtype)
    return out[0, :, :m].reshape(-1, n, ho, wo)


def conv_transpose2d_s2(x, w_stacked, bias, alpha, act, out_dtype=jnp.bfloat16):
    """Stride-2, padding-2, output_padding-1 ConvTranspose2d via the sub-pixel
    decomposition; all 4 parity convs run in ONE pallas_call (parity = grid
    axis 0) and outputs are interleaved back with a single transpose.
    x: [Cin, N, H, W]; w_stacked: [4, Co, Kd_max] bf16 (parity p = 2*ph + pw)."""
    cin, n, h, wid = x.shape
    m = n * h * wid
    tile_m = _pick_tile_m(m)
    m_p = _round_up(m, tile_m)
    kd_max = w_stacked.shape[-1]

    xb = x.astype(jnp.bfloat16)
    mats = []
    for ph in (0, 1):
        t_h, (ph_lo, ph_hi) = _PARITY_TAPS[ph]
        for pw in (0, 1):
            t_w, (pw_lo, pw_hi) = _PARITY_TAPS[pw]
            xp = jnp.pad(xb, ((0, 0), (0, 0), (ph_lo, ph_hi), (pw_lo, pw_hi)))
            mats.append(_patches(xp, len(t_h), len(t_w), h, wid, 1, kd_max, m_p))
    a = jnp.stack(mats, axis=0)                               # [4, kd_max, m_p]

    out = gemm_act(w_stacked, a, bias, alpha, act, tile_m, out_dtype=out_dtype)
    co = out.shape[1]
    out = out[:, :, :m].reshape(2, 2, co, n, h, wid)          # [ph, pw, Co, N, H, W]
    out = jnp.transpose(out, (2, 3, 4, 0, 5, 1))              # [Co, N, H, ph, W, pw]
    return out.reshape(co, n, 2 * h, 2 * wid)                 # (2h+ph, 2w+pw)


# --------------------------------------------------------------------------
# Parameter initialization (deterministic, PyTorch-like uniform bounds)
# --------------------------------------------------------------------------
ENC_CFG = [(3, 16, 2), (16, 32, 2), (32, 32, 1), (32, 32, 1)]      # + (32, 2k, 1)
DEC_CFG = [(None, 32, 1), (32, 32, 1), (32, 32, 1), (32, 16, 2), (16, 3, 2)]


def _tconv_wflat(w_t, kh_taps, kw_taps):
    """w_t: torch ConvTranspose2d weight [Cin, Cout, K, K] -> [Cout, Th*Tw*Cin]."""
    sub = w_t[:, :, jnp.asarray(kh_taps), :][:, :, :, jnp.asarray(kw_taps)]
    co = sub.shape[1]
    return jnp.transpose(sub, (1, 2, 3, 0)).reshape(co, -1)


def _pad_kd(wf):
    kd = wf.shape[-1]
    return jnp.pad(wf, ((0, 0), (0, _round_up(kd, KD_ALIGN) - kd)))


def init_params(key, k):
    params = {}
    enc = ENC_CFG + [(32, 2 * k, 1)]
    dec = [(2 * k,) + DEC_CFG[0][1:]] + DEC_CFG[1:]

    def uni(kk, shape, bound):
        return jax.random.uniform(kk, shape, jnp.float32, -bound, bound)

    for i, (cin, cout, _) in enumerate(enc):
        key, k1, k2 = jax.random.split(key, 3)
        bound = 1.0 / float(jnp.sqrt(cin * K_SIZE * K_SIZE))
        w = uni(k1, (cout, cin, K_SIZE, K_SIZE), bound)                # torch OIHW
        wf = jnp.transpose(w, (0, 2, 3, 1)).reshape(cout, -1)          # rows (kh,kw,ci)
        params[f"enc{i}_w"] = _pad_kd(wf).astype(jnp.bfloat16)[None]   # [1, Co, Kd_p]
        params[f"enc{i}_b"] = uni(k2, (cout,), bound).reshape(cout, 1)
        params[f"enc{i}_a"] = jnp.full((1,), 0.25, jnp.float32)        # PReLU init

    for i, (cin, cout, stride) in enumerate(dec):
        key, k1, k2 = jax.random.split(key, 3)
        bound = 1.0 / float(jnp.sqrt(cout * K_SIZE * K_SIZE))          # torch tconv fan_in
        w_t = uni(k1, (cin, cout, K_SIZE, K_SIZE), bound)              # torch [Cin,Cout,K,K]
        params[f"dec{i}_b"] = uni(k2, (cout,), bound).reshape(cout, 1)
        params[f"dec{i}_a"] = jnp.full((1,), 0.25, jnp.float32)        # unused for sigmoid
        if stride == 1:
            wf = _tconv_wflat(w_t, _FULL_TAPS, _FULL_TAPS)             # flipped kernel
            params[f"dec{i}_w"] = _pad_kd(wf).astype(jnp.bfloat16)[None]
        else:
            mats = []
            for ph in (0, 1):
                for pw in (0, 1):
                    mats.append(_tconv_wflat(w_t, _PARITY_TAPS[ph][0],
                                             _PARITY_TAPS[pw][0]))
            kd_max = _round_up(max(mm.shape[-1] for mm in mats), KD_ALIGN)
            mats = [jnp.pad(mm, ((0, 0), (0, kd_max - mm.shape[-1]))) for mm in mats]
            params[f"dec{i}_w"] = jnp.stack(mats, 0).astype(jnp.bfloat16)  # [4,Co,Kd]
    return params


# --------------------------------------------------------------------------
# Forward pass
# --------------------------------------------------------------------------
def autoencoder_forward(params, x_nchw, noise_key, k, snr_db=10.0,
                        channel_type="awgn", normalization_mode="dynamic"):
    if channel_type != "awgn":
        # TODO(synk): rayleigh_channel() was not provided in the source module.
        raise ValueError("Unsupported channel type.")

    n, _, h_in, w_in = x_nchw.shape
    hc, wc = h_in // 4, w_in // 4
    x = jnp.transpose(x_nchw, (1, 0, 2, 3))                   # NCHW -> CNHW

    # TODO(synk): awgn_channel() was not provided in the source; assume unit
    # signal power so the per-component noise std is sqrt(10^(-snr/10) / 2).
    sigma = jnp.sqrt(10.0 ** (-snr_db / 10.0) / 2.0)
    noise = sigma * jax.random.normal(noise_key, (2 * k, n, hc, wc), jnp.float32)

    # ---- encoder: 5 conv + PReLU, bf16 intermediates; AWGN add fused into
    #      the last GEMM epilogue when no global ('paper') normalization ----
    fuse_noise = normalization_mode != "paper"
    enc_strides = (2, 2, 1, 1, 1)
    h = x.astype(jnp.bfloat16)
    for i in range(5):
        last = i == 4
        fused = noise if (fuse_noise and last) else None
        out_dt = jnp.float32 if (last and not fuse_noise) else jnp.bfloat16
        h = conv2d(h, params[f"enc{i}_w"], params[f"enc{i}_b"],
                   params[f"enc{i}_a"], enc_strides[i], act="prelu",
                   noise=fused, out_dtype=out_dt)

    if fuse_noise:
        x_noisy = h                                   # 'dynamic': z = z_tilde (+AWGN)
    else:
        # 'paper': per-sample power normalization of the complex latent + AWGN,
        # with the scale multiply fused into the Pallas add kernel.
        k_total = k * hc * wc
        power = jnp.sum(jnp.square(h), axis=(0, 2, 3))                      # [N]
        scale = jnp.sqrt(jnp.float32(k_total)) / (jnp.sqrt(power) + 1e-8)   # [N]
        scale_cols = jnp.broadcast_to(scale[:, None], (n, hc * wc)).reshape(1, -1)
        x_noisy = scale_add(h.reshape(2 * k, -1), scale_cols,
                            noise.reshape(2 * k, -1)).reshape(2 * k, n, hc, wc)

    # ---- decoder: 3 stride-1 tconv + PReLU, stride-2 tconv + PReLU,
    #      stride-2 tconv + Sigmoid (final output stays f32) ----
    dec_strides = (1, 1, 1, 2, 2)
    dec_acts = ("prelu", "prelu", "prelu", "prelu", "sigmoid")
    h = x_noisy
    for i in range(5):
        out_dt = jnp.float32 if i == 4 else jnp.bfloat16
        if dec_strides[i] == 1:
            h = conv2d(h, params[f"dec{i}_w"], params[f"dec{i}_b"],
                       params[f"dec{i}_a"], 1, act=dec_acts[i], out_dtype=out_dt)
        else:
            h = conv_transpose2d_s2(h, params[f"dec{i}_w"], params[f"dec{i}_b"],
                                    params[f"dec{i}_a"], act=dec_acts[i],
                                    out_dtype=out_dt)

    return jnp.transpose(h, (1, 0, 2, 3))            # CNHW -> NCHW


# --------------------------------------------------------------------------
if __name__ == "__main__":
    k = 4
    key = jax.random.PRNGKey(0)
    k_params, k_input, k_noise = jax.random.split(key, 3)

    params = init_params(k_params, k)
    x = jax.random.uniform(k_input, (2, 3, 16, 16), jnp.float32)  # NCHW like torch

    forward = jax.jit(autoencoder_forward,
                      static_argnames=("k", "channel_type", "normalization_mode"))
    out = forward(params, x, k_noise, k=k, snr_db=10.0,
                  channel_type="awgn", normalization_mode="dynamic")
    out = jax.block_until_ready(out)

    assert out.shape == (2, 3, 16, 16), out.shape
    assert bool(jnp.all(jnp.isfinite(out)))
    assert bool(jnp.all((out >= 0.0) & (out <= 1.0)))  # sigmoid output range
    print("KERNEL_OK")
</pallas_src>

<mosaic_0001>
module attributes {stable_mosaic.version = 11 : i64} {
  func.func @_gemm_act_kernel(%arg0: i32, %arg1: i32, %arg2: memref<1x16x80xbf16, #tpu.memory_space<vmem>>, %arg3: memref<1x80x128xbf16, #tpu.memory_space<vmem>>, %arg4: memref<16x1xf32, #tpu.memory_space<vmem>>, %arg5: memref<1xf32, #tpu.memory_space<smem>>, %arg6: memref<1x16x128xbf16, #tpu.memory_space<vmem>>) attributes {dimension_semantics = [#tpu.dimension_semantics<parallel>, #tpu.dimension_semantics<parallel>], iteration_bounds = array<i64: 1, 1>, scalar_prefetch = 0 : i64, scratch_operands = 0 : i64, tpu.core_type = #tpu.core_type<tc>, window_params = [{transform_indices = @transform_0, window_bounds = array<i64: 1, 16, 80>}, {transform_indices = @transform_1, window_bounds = array<i64: 1, 80, 128>}, {pipeline_mode = #tpu.pipeline_mode<synchronous>, transform_indices = @transform_2, window_bounds = array<i64: 16, 1>}, {transform_indices = @transform_3, window_bounds = array<i64: 1>}, {transform_indices = @transform_4, window_bounds = array<i64: 1, 16, 128>}]} {
    %c0 = arith.constant 0 : index
    %c0_0 = arith.constant 0 : index
    %c0_1 = arith.constant 0 : index
    %0 = vector.load %arg2[%c0, %c0_0, %c0_1] : memref<1x16x80xbf16, #tpu.memory_space<vmem>>, vector<1x16x80xbf16>
    %1 = vector.shape_cast %0 : vector<1x16x80xbf16> to vector<16x80xbf16>
    %c0_2 = arith.constant 0 : index
    %c0_3 = arith.constant 0 : index
    %c0_4 = arith.constant 0 : index
    %2 = vector.load %arg3[%c0_2, %c0_3, %c0_4] : memref<1x80x128xbf16, #tpu.memory_space<vmem>>, vector<1x80x128xbf16>
    %3 = vector.shape_cast %2 : vector<1x80x128xbf16> to vector<80x128xbf16>
    %cst = arith.constant dense<0.000000e+00> : vector<16x128xf32>
    %4 = tpu.matmul %1, %3, %cst {dimension_numbers = #tpu.dot_dimension_numbers<[1], [0], [0], [1], [0, 0, 1, 1], [], []>} : vector<16x80xbf16>, vector<80x128xbf16>, vector<16x128xf32> -> vector<16x128xf32>
    %c0_5 = arith.constant 0 : index
    %c0_6 = arith.constant 0 : index
    %5 = vector.load %arg4[%c0_5, %c0_6] : memref<16x1xf32, #tpu.memory_space<vmem>>, vector<16x1xf32>
    %6 = vector.broadcast %5 : vector<16x1xf32> to vector<16x128xf32>
    %7 = arith.addf %4, %6 : vector<16x128xf32>
    %c0_7 = arith.constant 0 : index
    %8 = memref.load %arg5[%c0_7] : memref<1xf32, #tpu.memory_space<smem>>
    %cst_8 = arith.constant 0.000000e+00 : f32
    %9 = vector.broadcast %cst_8 : f32 to vector<16x128xf32>
    %10 = arith.cmpf oge, %7, %9 : vector<16x128xf32>
    %11 = vector.broadcast %8 : f32 to vector<16x128xf32>
    %12 = arith.mulf %11, %7 : vector<16x128xf32>
    %13 = arith.select %10, %7, %12 : vector<16x128xi1>, vector<16x128xf32>
    %14 = arith.truncf %13 : vector<16x128xf32> to vector<16x128xbf16>
    %c0_9 = arith.constant 0 : index
    %c0_10 = arith.constant 0 : index
    %c0_11 = arith.constant 0 : index
    %15 = vector.load %arg6[%c0_9, %c0_10, %c0_11] : memref<1x16x128xbf16, #tpu.memory_space<vmem>>, vector<1x16x128xbf16>
    %16 = vector.shape_cast %15 : vector<1x16x128xbf16> to vector<16x128xbf16>
    %17 = vector.shape_cast %14 : vector<16x128xbf16> to vector<1x16x128xbf16>
    tpu.vector_store %arg6[%c0_9, %c0_10, %c0_11], %17 {strides = array<i32>} : memref<1x16x128xbf16, #tpu.memory_space<vmem>>, vector<1x16x128xbf16>,
    return
  }
  func.func @transform_0(%arg0: i32, %arg1: i32) -> (i32, i32, i32) {
    %c0_i32 = arith.constant 0 : i32
    %c0_i32_0 = arith.constant 0 : i32
    %c0_i32_1 = arith.constant 0 : i32
    return %arg0, %c0_i32, %c0_i32_0 : i32, i32, i32
  }
  func.func @transform_1(%arg0: i32, %arg1: i32) -> (i32, i32, i32) {
    %c0_i32 = arith.constant 0 : i32
    %c0_i32_0 = arith.constant 0 : i32
    return %arg0, %c0_i32, %arg1 : i32, i32, i32
  }
  func.func @transform_2(%arg0: i32, %arg1: i32) -> (i32, i32) {
    %c0_i32 = arith.constant 0 : i32
    %c0_i32_0 = arith.constant 0 : i32
    %c0_i32_1 = arith.constant 0 : i32
    return %c0_i32, %c0_i32_0 : i32, i32
  }
  func.func @transform_3(%arg0: i32, %arg1: i32) -> i32 {
    %c0_i32 = arith.constant 0 : i32
    %c0_i32_0 = arith.constant 0 : i32
    return %c0_i32 : i32
  }
  func.func @transform_4(%arg0: i32, %arg1: i32) -> (i32, i32, i32) {
    %c0_i32 = arith.constant 0 : i32
    %c0_i32_0 = arith.constant 0 : i32
    return %arg0, %c0_i32, %arg1 : i32, i32, i32
  }
}

module attributes {stable_mosaic.version = 11 : i64} {
  func.func @_gemm_act_kernel(%arg0: i32, %arg1: i32, %arg2: memref<1x32x400xbf16, #tpu.memory_space<vmem>>, %arg3: memref<1x400x32xbf16, #tpu.memory_space<vmem>>, %arg4: memref<32x1xf32, #tpu.memory_space<vmem>>, %arg5: memref<1xf32, #tpu.memory_space<smem>>, %arg6: memref<1x32x32xbf16, #tpu.memory_space<vmem>>) attributes {dimension_semantics = [#tpu.dimension_semantics<parallel>, #tpu.dimension_semantics<parallel>], iteration_bounds = array<i64: 1, 1>, scalar_prefetch = 0 : i64, scratch_operands = 0 : i64, tpu.core_type = #tpu.core_type<tc>, window_params = [{transform_indices = @transform_0, window_bounds = array<i64: 1, 32, 400>}, {transform_indices = @transform_1, window_bounds = array<i64: 1, 400, 32>}, {pipeline_mode = #tpu.pipeline_mode<synchronous>, transform_indices = @transform_2, window_bounds = array<i64: 32, 1>}, {transform_indices = @transform_3, window_bounds = array<i64: 1>}, {transform_indices = @transform_4, window_bounds = array<i64: 1, 32, 32>}]} {
    %c0 = arith.constant 0 : index
    %c0_0 = arith.constant 0 : index
    %c0_1 = arith.constant 0 : index
    %0 = vector.load %arg2[%c0, %c0_0, %c0_1] : memref<1x32x400xbf16, #tpu.memory_space<vmem>>, vector<1x32x400xbf16>
    %1 = vector.shape_cast %0 : vector<1x32x400xbf16> to vector<32x400xbf16>
    %c0_2 = arith.constant 0 : index
    %c0_3 = arith.constant 0 : index
    %c0_4 = arith.constant 0 : index
    %2 = vector.load %arg3[%c0_2, %c0_3, %c0_4] : memref<1x400x32xbf16, #tpu.memory_space<vmem>>, vector<1x400x32xbf16>
    %3 = vector.shape_cast %2 : vector<1x400x32xbf16> to vector<400x32xbf16>
    %cst = arith.constant dense<0.000000e+00> : vector<32x32xf32>
    %4 = tpu.matmul %1, %3, %cst {dimension_numbers = #tpu.dot_dimension_numbers<[1], [0], [0], [1], [0, 0, 1, 1], [], []>} : vector<32x400xbf16>, vector<400x32xbf16>, vector<32x32xf32> -> vector<32x32xf32>
    %c0_5 = arith.constant 0 : index
    %c0_6 = arith.constant 0 : index
    %5 = vector.load %arg4[%c0_5, %c0_6] : memref<32x1xf32, #tpu.memory_space<vmem>>, vector<32x1xf32>
    %6 = vector.broadcast %5 : vector<32x1xf32> to vector<32x32xf32>
    %7 = arith.addf %4, %6 : vector<32x32xf32>
    %c0_7 = arith.constant 0 : index
    %8 = memref.load %arg5[%c0_7] : memref<1xf32, #tpu.memory_space<smem>>
    %cst_8 = arith.constant 0.000000e+00 : f32
    %9 = vector.broadcast %cst_8 : f32 to vector<32x32xf32>
    %10 = arith.cmpf oge, %7, %9 : vector<32x32xf32>
    %11 = vector.broadcast %8 : f32 to vector<32x32xf32>
    %12 = arith.mulf %11, %7 : vector<32x32xf32>
    %13 = arith.select %10, %7, %12 : vector<32x32xi1>, vector<32x32xf32>
    %14 = arith.truncf %13 : vector<32x32xf32> to vector<32x32xbf16>
    %c0_9 = arith.constant 0 : index
    %c0_10 = arith.constant 0 : index
    %c0_11 = arith.constant 0 : index
    %15 = vector.load %arg6[%c0_9, %c0_10, %c0_11] : memref<1x32x32xbf16, #tpu.memory_space<vmem>>, vector<1x32x32xbf16>
    %16 = vector.shape_cast %15 : vector<1x32x32xbf16> to vector<32x32xbf16>
    %17 = vector.shape_cast %14 : vector<32x32xbf16> to vector<1x32x32xbf16>
    tpu.vector_store %arg6[%c0_9, %c0_10, %c0_11], %17 {strides = array<i32>} : memref<1x32x32xbf16, #tpu.memory_space<vmem>>, vector<1x32x32xbf16>,
    return
  }
  func.func @transform_0(%arg0: i32, %arg1: i32) -> (i32, i32, i32) {
    %c0_i32 = arith.constant 0 : i32
    %c0_i32_0 = arith.constant 0 : i32
    %c0_i32_1 = arith.constant 0 : i32
    return %arg0, %c0_i32, %c0_i32_0 : i32, i32, i32
  }
  func.func @transform_1(%arg0: i32, %arg1: i32) -> (i32, i32, i32) {
    %c0_i32 = arith.constant 0 : i32
    %c0_i32_0 = arith.constant 0 : i32
    return %arg0, %c0_i32, %arg1 : i32, i32, i32
  }
  func.func @transform_2(%arg0: i32, %arg1: i32) -> (i32, i32) {
    %c0_i32 = arith.constant 0 : i32
    %c0_i32_0 = arith.constant 0 : i32
    %c0_i32_1 = arith.constant 0 : i32
    return %c0_i32, %c0_i32_0 : i32, i32
  }
  func.func @transform_3(%arg0: i32, %arg1: i32) -> i32 {
    %c0_i32 = arith.constant 0 : i32
    %c0_i32_0 = arith.constant 0 : i32
    return %c0_i32 : i32
  }
  func.func @transform_4(%arg0: i32, %arg1: i32) -> (i32, i32, i32) {
    %c0_i32 = arith.constant 0 : i32
    %c0_i32_0 = arith.constant 0 : i32
    return %arg0, %c0_i32, %arg1 : i32, i32, i32
  }
}

module attributes {stable_mosaic.version = 11 : i64} {
  func.func @_gemm_act_kernel(%arg0: i32, %arg1: i32, %arg2: memref<1x8x800xbf16, #tpu.memory_space<vmem>>, %arg3: memref<1x800x32xbf16, #tpu.memory_space<vmem>>, %arg4: memref<8x1xf32, #tpu.memory_space<vmem>>, %arg5: memref<1xf32, #tpu.memory_space<smem>>, %arg6: memref<1x8x32xf32, #tpu.memory_space<vmem>>, %arg7: memref<1x8x32xbf16, #tpu.memory_space<vmem>>) attributes {dimension_semantics = [#tpu.dimension_semantics<parallel>, #tpu.dimension_semantics<parallel>], iteration_bounds = array<i64: 1, 1>, scalar_prefetch = 0 : i64, scratch_operands = 0 : i64, tpu.core_type = #tpu.core_type<tc>, window_params = [{transform_indices = @transform_0, window_bounds = array<i64: 1, 8, 800>}, {transform_indices = @transform_1, window_bounds = array<i64: 1, 800, 32>}, {pipeline_mode = #tpu.pipeline_mode<synchronous>, transform_indices = @transform_2, window_bounds = array<i64: 8, 1>}, {transform_indices = @transform_3, window_bounds = array<i64: 1>}, {transform_indices = @transform_4, window_bounds = array<i64: 1, 8, 32>}, {transform_indices = @transform_5, window_bounds = array<i64: 1, 8, 32>}]} {
    %c0 = arith.constant 0 : index
    %c0_0 = arith.constant 0 : index
    %c0_1 = arith.constant 0 : index
    %0 = vector.load %arg2[%c0, %c0_0, %c0_1] : memref<1x8x800xbf16, #tpu.memory_space<vmem>>, vector<1x8x800xbf16>
    %1 = vector.shape_cast %0 : vector<1x8x800xbf16> to vector<8x800xbf16>
    %c0_2 = arith.constant 0 : index
    %c0_3 = arith.constant 0 : index
    %c0_4 = arith.constant 0 : index
    %2 = vector.load %arg3[%c0_2, %c0_3, %c0_4] : memref<1x800x32xbf16, #tpu.memory_space<vmem>>, vector<1x800x32xbf16>
    %3 = vector.shape_cast %2 : vector<1x800x32xbf16> to vector<800x32xbf16>
    %cst = arith.constant dense<0.000000e+00> : vector<8x32xf32>
    %4 = tpu.matmul %1, %3, %cst {dimension_numbers = #tpu.dot_dimension_numbers<[1], [0], [0], [1], [0, 0, 1, 1], [], []>} : vector<8x800xbf16>, vector<800x32xbf16>, vector<8x32xf32> -> vector<8x32xf32>
    %c0_5 = arith.constant 0 : index
    %c0_6 = arith.constant 0 : index
    %5 = vector.load %arg4[%c0_5, %c0_6] : memref<8x1xf32, #tpu.memory_space<vmem>>, vector<8x1xf32>
    %6 = vector.broadcast %5 : vector<8x1xf32> to vector<8x32xf32>
    %7 = arith.addf %4, %6 : vector<8x32xf32>
    %c0_7 = arith.constant 0 : index
    %8 = memref.load %arg5[%c0_7] : memref<1xf32, #tpu.memory_space<smem>>
    %cst_8 = arith.constant 0.000000e+00 : f32
    %9 = vector.broadcast %cst_8 : f32 to vector<8x32xf32>
    %10 = arith.cmpf oge, %7, %9 : vector<8x32xf32>
    %11 = vector.broadcast %8 : f32 to vector<8x32xf32>
    %12 = arith.mulf %11, %7 : vector<8x32xf32>
    %13 = arith.select %10, %7, %12 : vector<8x32xi1>, vector<8x32xf32>
    %c0_9 = arith.constant 0 : index
    %c0_10 = arith.constant 0 : index
    %c0_11 = arith.constant 0 : index
    %14 = vector.load %arg6[%c0_9, %c0_10, %c0_11] : memref<1x8x32xf32, #tpu.memory_space<vmem>>, vector<1x8x32xf32>
    %15 = vector.shape_cast %14 : vector<1x8x32xf32> to vector<8x32xf32>
    %16 = arith.addf %13, %15 : vector<8x32xf32>
    %17 = arith.truncf %16 : vector<8x32xf32> to vector<8x32xbf16>
    %c0_12 = arith.constant 0 : index
    %c0_13 = arith.constant 0 : index
    %c0_14 = arith.constant 0 : index
    %18 = vector.load %arg7[%c0_12, %c0_13, %c0_14] : memref<1x8x32xbf16, #tpu.memory_space<vmem>>, vector<1x8x32xbf16>
    %19 = vector.shape_cast %18 : vector<1x8x32xbf16> to vector<8x32xbf16>
    %20 = vector.shape_cast %17 : vector<8x32xbf16> to vector<1x8x32xbf16>
    tpu.vector_store %arg7[%c0_12, %c0_13, %c0_14], %20 {strides = array<i32>} : memref<1x8x32xbf16, #tpu.memory_space<vmem>>, vector<1x8x32xbf16>,
    return
  }
  func.func @transform_0(%arg0: i32, %arg1: i32) -> (i32, i32, i32) {
    %c0_i32 = arith.constant 0 : i32
    %c0_i32_0 = arith.constant 0 : i32
    %c0_i32_1 = arith.constant 0 : i32
    return %arg0, %c0_i32, %c0_i32_0 : i32, i32, i32
  }
  func.func @transform_1(%arg0: i32, %arg1: i32) -> (i32, i32, i32) {
    %c0_i32 = arith.constant 0 : i32
    %c0_i32_0 = arith.constant 0 : i32
    return %arg0, %c0_i32, %arg1 : i32, i32, i32
  }
  func.func @transform_2(%arg0: i32, %arg1: i32) -> (i32, i32) {
    %c0_i32 = arith.constant 0 : i32
    %c0_i32_0 = arith.constant 0 : i32
    %c0_i32_1 = arith.constant 0 : i32
    return %c0_i32, %c0_i32_0 : i32, i32
  }
  func.func @transform_3(%arg0: i32, %arg1: i32) -> i32 {
    %c0_i32 = arith.constant 0 : i32
    %c0_i32_0 = arith.constant 0 : i32
    return %c0_i32 : i32
  }
  func.func @transform_4(%arg0: i32, %arg1: i32) -> (i32, i32, i32) {
    %c0_i32 = arith.constant 0 : i32
    %c0_i32_0 = arith.constant 0 : i32
    %c0_i32_1 = arith.constant 0 : i32
    return %c0_i32, %c0_i32_0, %arg1 : i32, i32, i32
  }
  func.func @transform_5(%arg0: i32, %arg1: i32) -> (i32, i32, i32) {
    %c0_i32 = arith.constant 0 : i32
    %c0_i32_0 = arith.constant 0 : i32
    return %arg0, %c0_i32, %arg1 : i32, i32, i32
  }
}

module attributes {stable_mosaic.version = 11 : i64} {
  func.func @_gemm_act_kernel(%arg0: i32, %arg1: i32, %arg2: memref<1x32x800xbf16, #tpu.memory_space<vmem>>, %arg3: memref<1x800x32xbf16, #tpu.memory_space<vmem>>, %arg4: memref<32x1xf32, #tpu.memory_space<vmem>>, %arg5: memref<1xf32, #tpu.memory_space<smem>>, %arg6: memref<1x32x32xbf16, #tpu.memory_space<vmem>>) attributes {dimension_semantics = [#tpu.dimension_semantics<parallel>, #tpu.dimension_semantics<parallel>], iteration_bounds = array<i64: 1, 1>, scalar_prefetch = 0 : i64, scratch_operands = 0 : i64, tpu.core_type = #tpu.core_type<tc>, window_params = [{transform_indices = @transform_0, window_bounds = array<i64: 1, 32, 800>}, {transform_indices = @transform_1, window_bounds = array<i64: 1, 800, 32>}, {pipeline_mode = #tpu.pipeline_mode<synchronous>, transform_indices = @transform_2, window_bounds = array<i64: 32, 1>}, {transform_indices = @transform_3, window_bounds = array<i64: 1>}, {transform_indices = @transform_4, window_bounds = array<i64: 1, 32, 32>}]} {
    %c0 = arith.constant 0 : index
    %c0_0 = arith.constant 0 : index
    %c0_1 = arith.constant 0 : index
    %0 = vector.load %arg2[%c0, %c0_0, %c0_1] : memref<1x32x800xbf16, #tpu.memory_space<vmem>>, vector<1x32x800xbf16>
    %1 = vector.shape_cast %0 : vector<1x32x800xbf16> to vector<32x800xbf16>
    %c0_2 = arith.constant 0 : index
    %c0_3 = arith.constant 0 : index
    %c0_4 = arith.constant 0 : index
    %2 = vector.load %arg3[%c0_2, %c0_3, %c0_4] : memref<1x800x32xbf16, #tpu.memory_space<vmem>>, vector<1x800x32xbf16>
    %3 = vector.shape_cast %2 : vector<1x800x32xbf16> to vector<800x32xbf16>
    %cst = arith.constant dense<0.000000e+00> : vector<32x32xf32>
    %4 = tpu.matmul %1, %3, %cst {dimension_numbers = #tpu.dot_dimension_numbers<[1], [0], [0], [1], [0, 0, 1, 1], [], []>} : vector<32x800xbf16>, vector<800x32xbf16>, vector<32x32xf32> -> vector<32x32xf32>
    %c0_5 = arith.constant 0 : index
    %c0_6 = arith.constant 0 : index
    %5 = vector.load %arg4[%c0_5, %c0_6] : memref<32x1xf32, #tpu.memory_space<vmem>>, vector<32x1xf32>
    %6 = vector.broadcast %5 : vector<32x1xf32> to vector<32x32xf32>
    %7 = arith.addf %4, %6 : vector<32x32xf32>
    %c0_7 = arith.constant 0 : index
    %8 = memref.load %arg5[%c0_7] : memref<1xf32, #tpu.memory_space<smem>>
    %cst_8 = arith.constant 0.000000e+00 : f32
    %9 = vector.broadcast %cst_8 : f32 to vector<32x32xf32>
    %10 = arith.cmpf oge, %7, %9 : vector<32x32xf32>
    %11 = vector.broadcast %8 : f32 to vector<32x32xf32>
    %12 = arith.mulf %11, %7 : vector<32x32xf32>
    %13 = arith.select %10, %7, %12 : vector<32x32xi1>, vector<32x32xf32>
    %14 = arith.truncf %13 : vector<32x32xf32> to vector<32x32xbf16>
    %c0_9 = arith.constant 0 : index
    %c0_10 = arith.constant 0 : index
    %c0_11 = arith.constant 0 : index
    %15 = vector.load %arg6[%c0_9, %c0_10, %c0_11] : memref<1x32x32xbf16, #tpu.memory_space<vmem>>, vector<1x32x32xbf16>
    %16 = vector.shape_cast %15 : vector<1x32x32xbf16> to vector<32x32xbf16>
    %17 = vector.shape_cast %14 : vector<32x32xbf16> to vector<1x32x32xbf16>
    tpu.vector_store %arg6[%c0_9, %c0_10, %c0_11], %17 {strides = array<i32>} : memref<1x32x32xbf16, #tpu.memory_space<vmem>>, vector<1x32x32xbf16>,
    return
  }
  func.func @transform_0(%arg0: i32, %arg1: i32) -> (i32, i32, i32) {
    %c0_i32 = arith.constant 0 : i32
    %c0_i32_0 = arith.constant 0 : i32
    %c0_i32_1 = arith.constant 0 : i32
    return %arg0, %c0_i32, %c0_i32_0 : i32, i32, i32
  }
  func.func @transform_1(%arg0: i32, %arg1: i32) -> (i32, i32, i32) {
    %c0_i32 = arith.constant 0 : i32
    %c0_i32_0 = arith.constant 0 : i32
    return %arg0, %c0_i32, %arg1 : i32, i32, i32
  }
  func.func @transform_2(%arg0: i32, %arg1: i32) -> (i32, i32) {
    %c0_i32 = arith.constant 0 : i32
    %c0_i32_0 = arith.constant 0 : i32
    %c0_i32_1 = arith.constant 0 : i32
    return %c0_i32, %c0_i32_0 : i32, i32
  }
  func.func @transform_3(%arg0: i32, %arg1: i32) -> i32 {
    %c0_i32 = arith.constant 0 : i32
    %c0_i32_0 = arith.constant 0 : i32
    return %c0_i32 : i32
  }
  func.func @transform_4(%arg0: i32, %arg1: i32) -> (i32, i32, i32) {
    %c0_i32 = arith.constant 0 : i32
    %c0_i32_0 = arith.constant 0 : i32
    return %arg0, %c0_i32, %arg1 : i32, i32, i32
  }
}

module attributes {stable_mosaic.version = 11 : i64} {
  func.func @_gemm_act_kernel(%arg0: i32, %arg1: i32, %arg2: memref<1x32x208xbf16, #tpu.memory_space<vmem>>, %arg3: memref<1x208x32xbf16, #tpu.memory_space<vmem>>, %arg4: memref<32x1xf32, #tpu.memory_space<vmem>>, %arg5: memref<1xf32, #tpu.memory_space<smem>>, %arg6: memref<1x32x32xbf16, #tpu.memory_space<vmem>>) attributes {dimension_semantics = [#tpu.dimension_semantics<parallel>, #tpu.dimension_semantics<parallel>], iteration_bounds = array<i64: 1, 1>, scalar_prefetch = 0 : i64, scratch_operands = 0 : i64, tpu.core_type = #tpu.core_type<tc>, window_params = [{transform_indices = @transform_0, window_bounds = array<i64: 1, 32, 208>}, {transform_indices = @transform_1, window_bounds = array<i64: 1, 208, 32>}, {pipeline_mode = #tpu.pipeline_mode<synchronous>, transform_indices = @transform_2, window_bounds = array<i64: 32, 1>}, {transform_indices = @transform_3, window_bounds = array<i64: 1>}, {transform_indices = @transform_4, window_bounds = array<i64: 1, 32, 32>}]} {
    %c0 = arith.constant 0 : index
    %c0_0 = arith.constant 0 : index
    %c0_1 = arith.constant 0 : index
    %0 = vector.load %arg2[%c0, %c0_0, %c0_1] : memref<1x32x208xbf16, #tpu.memory_space<vmem>>, vector<1x32x208xbf16>
    %1 = vector.shape_cast %0 : vector<1x32x208xbf16> to vector<32x208xbf16>
    %c0_2 = arith.constant 0 : index
    %c0_3 = arith.constant 0 : index
    %c0_4 = arith.constant 0 : index
    %2 = vector.load %arg3[%c0_2, %c0_3, %c0_4] : memref<1x208x32xbf16, #tpu.memory_space<vmem>>, vector<1x208x32xbf16>
    %3 = vector.shape_cast %2 : vector<1x208x32xbf16> to vector<208x32xbf16>
    %cst = arith.constant dense<0.000000e+00> : vector<32x32xf32>
    %4 = tpu.matmul %1, %3, %cst {dimension_numbers = #tpu.dot_dimension_numbers<[1], [0], [0], [1], [0, 0, 1, 1], [], []>} : vector<32x208xbf16>, vector<208x32xbf16>, vector<32x32xf32> -> vector<32x32xf32>
    %c0_5 = arith.constant 0 : index
    %c0_6 = arith.constant 0 : index
    %5 = vector.load %arg4[%c0_5, %c0_6] : memref<32x1xf32, #tpu.memory_space<vmem>>, vector<32x1xf32>
    %6 = vector.broadcast %5 : vector<32x1xf32> to vector<32x32xf32>
    %7 = arith.addf %4, %6 : vector<32x32xf32>
    %c0_7 = arith.constant 0 : index
    %8 = memref.load %arg5[%c0_7] : memref<1xf32, #tpu.memory_space<smem>>
    %cst_8 = arith.constant 0.000000e+00 : f32
    %9 = vector.broadcast %cst_8 : f32 to vector<32x32xf32>
    %10 = arith.cmpf oge, %7, %9 : vector<32x32xf32>
    %11 = vector.broadcast %8 : f32 to vector<32x32xf32>
    %12 = arith.mulf %11, %7 : vector<32x32xf32>
    %13 = arith.select %10, %7, %12 : vector<32x32xi1>, vector<32x32xf32>
    %14 = arith.truncf %13 : vector<32x32xf32> to vector<32x32xbf16>
    %c0_9 = arith.constant 0 : index
    %c0_10 = arith.constant 0 : index
    %c0_11 = arith.constant 0 : index
    %15 = vector.load %arg6[%c0_9, %c0_10, %c0_11] : memref<1x32x32xbf16, #tpu.memory_space<vmem>>, vector<1x32x32xbf16>
    %16 = vector.shape_cast %15 : vector<1x32x32xbf16> to vector<32x32xbf16>
    %17 = vector.shape_cast %14 : vector<32x32xbf16> to vector<1x32x32xbf16>
    tpu.vector_store %arg6[%c0_9, %c0_10, %c0_11], %17 {strides = array<i32>} : memref<1x32x32xbf16, #tpu.memory_space<vmem>>, vector<1x32x32xbf16>,
    return
  }
  func.func @transform_0(%arg0: i32, %arg1: i32) -> (i32, i32, i32) {
    %c0_i32 = arith.constant 0 : i32
    %c0_i32_0 = arith.constant 0 : i32
    %c0_i32_1 = arith.constant 0 : i32
    return %arg0, %c0_i32, %c0_i32_0 : i32, i32, i32
  }
  func.func @transform_1(%arg0: i32, %arg1: i32) -> (i32, i32, i32) {
    %c0_i32 = arith.constant 0 : i32
    %c0_i32_0 = arith.constant 0 : i32
    return %arg0, %c0_i32, %arg1 : i32, i32, i32
  }
  func.func @transform_2(%arg0: i32, %arg1: i32) -> (i32, i32) {
    %c0_i32 = arith.constant 0 : i32
    %c0_i32_0 = arith.constant 0 : i32
    %c0_i32_1 = arith.constant 0 : i32
    return %c0_i32, %c0_i32_0 : i32, i32
  }
  func.func @transform_3(%arg0: i32, %arg1: i32) -> i32 {
    %c0_i32 = arith.constant 0 : i32
    %c0_i32_0 = arith.constant 0 : i32
    return %c0_i32 : i32
  }
  func.func @transform_4(%arg0: i32, %arg1: i32) -> (i32, i32, i32) {
    %c0_i32 = arith.constant 0 : i32
    %c0_i32_0 = arith.constant 0 : i32
    return %arg0, %c0_i32, %arg1 : i32, i32, i32
  }
}

module attributes {stable_mosaic.version = 11 : i64} {
  func.func @_gemm_act_kernel(%arg0: i32, %arg1: i32, %arg2: memref<1x16x288xbf16, #tpu.memory_space<vmem>>, %arg3: memref<1x288x32xbf16, #tpu.memory_space<vmem>>, %arg4: memref<16x1xf32, #tpu.memory_space<vmem>>, %arg5: memref<1xf32, #tpu.memory_space<smem>>, %arg6: memref<1x16x32xbf16, #tpu.memory_space<vmem>>) attributes {dimension_semantics = [#tpu.dimension_semantics<parallel>, #tpu.dimension_semantics<parallel>], iteration_bounds = array<i64: 4, 1>, scalar_prefetch = 0 : i64, scratch_operands = 0 : i64, tpu.core_type = #tpu.core_type<tc>, window_params = [{transform_indices = @transform_0, window_bounds = array<i64: 1, 16, 288>}, {transform_indices = @transform_1, window_bounds = array<i64: 1, 288, 32>}, {pipeline_mode = #tpu.pipeline_mode<synchronous>, transform_indices = @transform_2, window_bounds = array<i64: 16, 1>}, {transform_indices = @transform_3, window_bounds = array<i64: 1>}, {transform_indices = @transform_4, window_bounds = array<i64: 1, 16, 32>}]} {
    %c0 = arith.constant 0 : index
    %c0_0 = arith.constant 0 : index
    %c0_1 = arith.constant 0 : index
    %0 = vector.load %arg2[%c0, %c0_0, %c0_1] : memref<1x16x288xbf16, #tpu.memory_space<vmem>>, vector<1x16x288xbf16>
    %1 = vector.shape_cast %0 : vector<1x16x288xbf16> to vector<16x288xbf16>
    %c0_2 = arith.constant 0 : index
    %c0_3 = arith.constant 0 : index
    %c0_4 = arith.constant 0 : index
    %2 = vector.load %arg3[%c0_2, %c0_3, %c0_4] : memref<1x288x32xbf16, #tpu.memory_space<vmem>>, vector<1x288x32xbf16>
    %3 = vector.shape_cast %2 : vector<1x288x32xbf16> to vector<288x32xbf16>
    %cst = arith.constant dense<0.000000e+00> : vector<16x32xf32>
    %4 = tpu.matmul %1, %3, %cst {dimension_numbers = #tpu.dot_dimension_numbers<[1], [0], [0], [1], [0, 0, 1, 1], [], []>} : vector<16x288xbf16>, vector<288x32xbf16>, vector<16x32xf32> -> vector<16x32xf32>
    %c0_5 = arith.constant 0 : index
    %c0_6 = arith.constant 0 : index
    %5 = vector.load %arg4[%c0_5, %c0_6] : memref<16x1xf32, #tpu.memory_space<vmem>>, vector<16x1xf32>
    %6 = vector.broadcast %5 : vector<16x1xf32> to vector<16x32xf32>
    %7 = arith.addf %4, %6 : vector<16x32xf32>
    %c0_7 = arith.constant 0 : index
    %8 = memref.load %arg5[%c0_7] : memref<1xf32, #tpu.memory_space<smem>>
    %cst_8 = arith.constant 0.000000e+00 : f32
    %9 = vector.broadcast %cst_8 : f32 to vector<16x32xf32>
    %10 = arith.cmpf oge, %7, %9 : vector<16x32xf32>
    %11 = vector.broadcast %8 : f32 to vector<16x32xf32>
    %12 = arith.mulf %11, %7 : vector<16x32xf32>
    %13 = arith.select %10, %7, %12 : vector<16x32xi1>, vector<16x32xf32>
    %14 = arith.truncf %13 : vector<16x32xf32> to vector<16x32xbf16>
    %c0_9 = arith.constant 0 : index
    %c0_10 = arith.constant 0 : index
    %c0_11 = arith.constant 0 : index
    %15 = vector.load %arg6[%c0_9, %c0_10, %c0_11] : memref<1x16x32xbf16, #tpu.memory_space<vmem>>, vector<1x16x32xbf16>
    %16 = vector.shape_cast %15 : vector<1x16x32xbf16> to vector<16x32xbf16>
    %17 = vector.shape_cast %14 : vector<16x32xbf16> to vector<1x16x32xbf16>
    tpu.vector_store %arg6[%c0_9, %c0_10, %c0_11], %17 {strides = array<i32>} : memref<1x16x32xbf16, #tpu.memory_space<vmem>>, vector<1x16x32xbf16>,
    return
  }
  func.func @transform_0(%arg0: i32, %arg1: i32) -> (i32, i32, i32) {
    %c0_i32 = arith.constant 0 : i32
    %c0_i32_0 = arith.constant 0 : i32
    %c0_i32_1 = arith.constant 0 : i32
    return %arg0, %c0_i32, %c0_i32_0 : i32, i32, i32
  }
  func.func @transform_1(%arg0: i32, %arg1: i32) -> (i32, i32, i32) {
    %c0_i32 = arith.constant 0 : i32
    %c0_i32_0 = arith.constant 0 : i32
    return %arg0, %c0_i32, %arg1 : i32, i32, i32
  }
  func.func @transform_2(%arg0: i32, %arg1: i32) -> (i32, i32) {
    %c0_i32 = arith.constant 0 : i32
    %c0_i32_0 = arith.constant 0 : i32
    %c0_i32_1 = arith.constant 0 : i32
    return %c0_i32, %c0_i32_0 : i32, i32
  }
  func.func @transform_3(%arg0: i32, %arg1: i32) -> i32 {
    %c0_i32 = arith.constant 0 : i32
    %c0_i32_0 = arith.constant 0 : i32
    return %c0_i32 : i32
  }
  func.func @transform_4(%arg0: i32, %arg1: i32) -> (i32, i32, i32) {
    %c0_i32 = arith.constant 0 : i32
    %c0_i32_0 = arith.constant 0 : i32
    return %arg0, %c0_i32, %arg1 : i32, i32, i32
  }
}

module attributes {stable_mosaic.version = 11 : i64} {
  func.func @_gemm_act_kernel(%arg0: i32, %arg1: i32, %arg2: memref<1x3x144xbf16, #tpu.memory_space<vmem>>, %arg3: memref<1x144x128xbf16, #tpu.memory_space<vmem>>, %arg4: memref<3x1xf32, #tpu.memory_space<vmem>>, %arg5: memref<1xf32, #tpu.memory_space<smem>>, %arg6: memref<1x3x128xf32, #tpu.memory_space<vmem>>) attributes {dimension_semantics = [#tpu.dimension_semantics<parallel>, #tpu.dimension_semantics<parallel>], iteration_bounds = array<i64: 4, 1>, scalar_prefetch = 0 : i64, scratch_operands = 0 : i64, tpu.core_type = #tpu.core_type<tc>, window_params = [{transform_indices = @transform_0, window_bounds = array<i64: 1, 3, 144>}, {transform_indices = @transform_1, window_bounds = array<i64: 1, 144, 128>}, {pipeline_mode = #tpu.pipeline_mode<synchronous>, transform_indices = @transform_2, window_bounds = array<i64: 3, 1>}, {transform_indices = @transform_3, window_bounds = array<i64: 1>}, {transform_indices = @transform_4, window_bounds = array<i64: 1, 3, 128>}]} {
    %c0 = arith.constant 0 : index
    %c0_0 = arith.constant 0 : index
    %c0_1 = arith.constant 0 : index
    %0 = vector.load %arg2[%c0, %c0_0, %c0_1] : memref<1x3x144xbf16, #tpu.memory_space<vmem>>, vector<1x3x144xbf16>
    %1 = vector.shape_cast %0 : vector<1x3x144xbf16> to vector<3x144xbf16>
    %c0_2 = arith.constant 0 : index
    %c0_3 = arith.constant 0 : index
    %c0_4 = arith.constant 0 : index
    %2 = vector.load %arg3[%c0_2, %c0_3, %c0_4] : memref<1x144x128xbf16, #tpu.memory_space<vmem>>, vector<1x144x128xbf16>
    %3 = vector.shape_cast %2 : vector<1x144x128xbf16> to vector<144x128xbf16>
    %cst = arith.constant dense<0.000000e+00> : vector<3x128xf32>
    %4 = tpu.matmul %1, %3, %cst {dimension_numbers = #tpu.dot_dimension_numbers<[1], [0], [0], [1], [0, 0, 1, 1], [], []>} : vector<3x144xbf16>, vector<144x128xbf16>, vector<3x128xf32> -> vector<3x128xf32>
    %c0_5 = arith.constant 0 : index
    %c0_6 = arith.constant 0 : index
    %5 = vector.load %arg4[%c0_5, %c0_6] : memref<3x1xf32, #tpu.memory_space<vmem>>, vector<3x1xf32>
    %6 = vector.broadcast %5 : vector<3x1xf32> to vector<3x128xf32>
    %7 = arith.addf %4, %6 : vector<3x128xf32>
    %8 = arith.negf %7 : vector<3x128xf32>
    %9 = math.exp %8 : vector<3x128xf32>
    %cst_7 = arith.constant 1.000000e+00 : f32
    %10 = vector.broadcast %cst_7 : f32 to vector<3x128xf32>
    %11 = arith.addf %10, %9 : vector<3x128xf32>
    %12 = arith.divf %10, %11 : vector<3x128xf32>
    %c0_8 = arith.constant 0 : index
    %c0_9 = arith.constant 0 : index
    %c0_10 = arith.constant 0 : index
    %13 = vector.load %arg6[%c0_8, %c0_9, %c0_10] : memref<1x3x128xf32, #tpu.memory_space<vmem>>, vector<1x3x128xf32>
    %14 = vector.shape_cast %13 : vector<1x3x128xf32> to vector<3x128xf32>
    %15 = vector.shape_cast %12 : vector<3x128xf32> to vector<1x3x128xf32>
    tpu.vector_store %arg6[%c0_8, %c0_9, %c0_10], %15 {strides = array<i32>} : memref<1x3x128xf32, #tpu.memory_space<vmem>>, vector<1x3x128xf32>,
    return
  }
  func.func @transform_0(%arg0: i32, %arg1: i32) -> (i32, i32, i32) {
    %c0_i32 = arith.constant 0 : i32
    %c0_i32_0 = arith.constant 0 : i32
    %c0_i32_1 = arith.constant 0 : i32
    return %arg0, %c0_i32, %c0_i32_0 : i32, i32, i32
  }
  func.func @transform_1(%arg0: i32, %arg1: i32) -> (i32, i32, i32) {
    %c0_i32 = arith.constant 0 : i32
    %c0_i32_0 = arith.constant 0 : i32
    return %arg0, %c0_i32, %arg1 : i32, i32, i32
  }
  func.func @transform_2(%arg0: i32, %arg1: i32) -> (i32, i32) {
    %c0_i32 = arith.constant 0 : i32
    %c0_i32_0 = arith.constant 0 : i32
    %c0_i32_1 = arith.constant 0 : i32
    return %c0_i32, %c0_i32_0 : i32, i32
  }
  func.func @transform_3(%arg0: i32, %arg1: i32) -> i32 {
    %c0_i32 = arith.constant 0 : i32
    %c0_i32_0 = arith.constant 0 : i32
    return %c0_i32 : i32
  }
  func.func @transform_4(%arg0: i32, %arg1: i32) -> (i32, i32, i32) {
    %c0_i32 = arith.constant 0 : i32
    %c0_i32_0 = arith.constant 0 : i32
    return %arg0, %c0_i32, %arg1 : i32, i32, i32
  }
}

</mosaic_0001>

<bundles_post_ra>
// kernel: autoencoder_forward.10
= control target key start
LH: loop header
LB: loop body
LE: loop exit
PB: predicated region body
PF: predicated region fallthrough
CT: control target
= control target key end

     0   :  { %v150_v1 = vmov 0   ;;  %vm78_vm0 = vcmask 654336   ;;  %s206_s1 = inlined_call_operand.vmem [shape: bf16[1,80,128], index: 1, kind: input, shape index: {}]   ;;  %s207_s2 = inlined_call_operand.vmem [shape: f32[16,1], index: 2, kind: input, shape index: {}]   ;;  %s208_s0 = inlined_call_operand.vmem [shape: bf16[1,16,80], index: 0, kind: input, shape index: {}]   ;;  %s209_s3 = inlined_call_operand.<no memory space> [shape: f32[1], index: 3, kind: input, shape index: {}]   ;;  %s210_s4 = inlined_call_operand.vmem [shape: bf16[1,16,128], index: 4, kind: output, shape index: {}]  }
   0x1   :  { %v142_v0 = vld [vmem:[%s206_s1 + $0x20] sm:$0xff]  ;;  %149 = vset.pattern.permute.xlu0 %v150_v1  ;;  %v141_v2 = vld [vmem:[%s206_s1 + $0x18] sm:$0xff]  ;;  %v140_v4 = vld [vmem:[%s206_s1 + $0x10] sm:$0xff]  ;;  %v99_v12 = vstv %s209_s3 }
   0x2   :  { %85 = vmatpush.bf16.msra.mxu0 %v142_v0  ;;  %v31_v3 = vld [vmem:[%s207_s2] sm:$0xff]  ;;  %v32_v5 = vld [vmem:[%s207_s2 + $0x8] sm:$0xff] }
   0x3   :  { %35 = vperm.xlu0 %149, %v31_v3   ;;  %v139_v6 = vld [vmem:[%s206_s1 + $0x8] sm:$0xff]  ;;  %v138_v7 = vld [vmem:[%s206_s1] sm:$0xff] }
   0x4   :  { %v137_v8 = vld [vmem:[%s208_s0] sm:$0xff] }
   0x6   :  { %86 = vmatpush.bf16.msra.mxu0 %v141_v2 }
   0xa   :  { %87 = vmatpush.bf16.msra.mxu0 %v140_v4 }
   0xb   :  { %40 = vperm.xlu0 %149, %v32_v5  }
   0xe   :  { %88 = vmatpush.bf16.msra.mxu0 %v139_v6 }
  0x12   :  { %89 = vmatpush.bf16.msra.mxu0 %v138_v7 }
  0x15   :  { %136 = vmatmul.msk.bf16.vlgmr.msra.gmra.mxu0 %vm78_vm0, %v137_v8 }
  0x75   :  { %v36_v9 = vpop.permute.xlu0 %35 }
  0x7d   :  { %v41_v13 = vpop.permute.xlu0 %40 }
  0x92   :  { %v91_v10 = vpop.f32.mrf.mxu0 }
  0x93   :  { %v92_v11 = vadd.f32 %v91_v10, %v36_v9 }
  0x95   :  { %v100_v15 = vmul.f32 %v99_v12, %v92_v11  ;;  %vm97_vm1 = vcmp.ge.f32.partialorder %v92_v11, 0.0 }
  0x97   :  { %v102_v18 = vsel %vm97_vm1, %v92_v11, %v100_v15 }
  0x9a   :  { %v93_v14 = vpop.f32.mrf.mxu0 }
  0x9b   :  { %v94_v16 = vadd.f32 %v93_v14, %v41_v13 }
  0x9d   :  { %vm98_vm2 = vcmp.ge.f32.partialorder %v94_v16, 0.0  ;;  %v101_v17 = vmul.f32 %v99_v12, %v94_v16 }
  0x9f   :  { %v103_v19 = vsel %vm98_vm2, %v94_v16, %v101_v17 }
  0xa0   :  { %v146_v20 = vpack.c.bf16 %v103_v19, %v102_v18 }
  0xa2   :  { %147 = vst [vmem:[%s210_s4] sm:$0xff] %v146_v20  }

// kernel: autoencoder_forward.11
= control target key start
LH: loop header
LB: loop body
LE: loop exit
PB: predicated region body
PF: predicated region fallthrough
CT: control target
= control target key end

     0   :  { %v569_v6 = vmov 0   ;;  %vm289_vm0 = vcmask 130048   ;;  %vm390_vm2 = vcmask 257024   ;;  %s751_s1 = inlined_call_operand.vmem [shape: bf16[1,400,32], index: 1, kind: input, shape index: {}]   ;;  %s752_s0 = inlined_call_operand.vmem [shape: bf16[1,32,400], index: 0, kind: input, shape index: {}]   ;;  %s753_s2 = inlined_call_operand.vmem [shape: f32[32,1], index: 2, kind: input, shape index: {}]   ;;  %s754_s3 = inlined_call_operand.<no memory space> [shape: f32[1], index: 3, kind: input, shape index: {}]   ;;  %s755_s4 = inlined_call_operand.vmem [shape: bf16[1,32,32], index: 4, kind: output, shape index: {}]  }
   0x1   :  { %v548_v0 = vld [vmem:[%s751_s1 + $0x38] sm:$0xff]  ;;  %v547_v3 = vld [vmem:[%s751_s1 + $0x30] sm:$0xff]  ;;  %567 = vset.pattern.permute.xlu0 %v569_v6  ;;  %568 = vset.pattern.permute.xlu1 %v569_v6  ;;  %v546_v7 = vld [vmem:[%s751_s1 + $0x28] sm:$0xff] }
   0x2   :  { %v556_v1 = vld [vmem:[%s751_s1 + $0x78] sm:$0xff]  ;;  %296 = vmatpush.bf16.msra.mxu0 %v548_v0  ;;  %v555_v4 = vld [vmem:[%s751_s1 + $0x70] sm:$0xff]  ;;  %v554_v8 = vld [vmem:[%s751_s1 + $0x68] sm:$0xff]  ;;  %v377_v0 = vstv %s754_s3 }
   0x3   :  { %v564_v2 = vld [vmem:[%s751_s1 + $0xb8] sm:$0xff]  ;;  %315 = vmatpush.bf16.msra.mxu1 %v556_v1  ;;  %v563_v5 = vld [vmem:[%s751_s1 + $0xb0] sm:$0xff]  ;;  %v565_v9 = vld [vmem:[%s751_s1 + $0xc0] sm:$0xff] }
   0x4   :  { %334 = vmatpush.bf16.msra.mxu2 %v564_v2  ;;  %v562_v10 = vld [vmem:[%s751_s1 + $0xa8] sm:$0xff]  ;;  %v411_v12 = vld [vmem:[%s752_s0 + $0x18] sm:$0xf0]  ;;  %360 = vmatpush.bf16.msra.mxu3 %v565_v9  ;;  %v545_v14 = vld [vmem:[%s751_s1 + $0x20] sm:$0xff] }
   0x5   :  { %v534_v11 = vld [vmem:[%s752_s0 + $0xc] sm:$0xf]  ;;  %v553_v15 = vld [vmem:[%s751_s1 + $0x60] sm:$0xff]  ;;  %v544_v18 = vld [vmem:[%s751_s1 + $0x18] sm:$0xff] }
   0x6   :  { %297 = vmatpush.bf16.msra.mxu0 %v547_v3  ;;  %v414_v13 = vor.u32 %v534_v11, %v411_v12  ;;  %v561_v16 = vld [vmem:[%s751_s1 + $0xa0] sm:$0xff]  ;;  %v552_v19 = vld [vmem:[%s751_s1 + $0x58] sm:$0xff]  ;;  %v543_v21 = vld [vmem:[%s751_s1 + $0x10] sm:$0xff] }
   0x7   :  { %316 = vmatpush.bf16.msra.mxu1 %v555_v4  ;;  %v77_v17 = vld [vmem:[%s753_s2] sm:$0xff]  ;;  %v560_v20 = vld [vmem:[%s751_s1 + $0x98] sm:$0xff]  ;;  %v551_v22 = vld [vmem:[%s751_s1 + $0x50] sm:$0xff] }
   0x8   :  { %335 = vmatpush.bf16.msra.mxu2 %v563_v5  ;;  %531 = vmatmul.msk.bf16.vlgmr.msra.gmra.mxu3 %vm289_vm0, %v414_v13  ;;  %v78_v23 = vld [vmem:[%s753_s2 + $0x8] sm:$0xff]  ;;  %v79_v24 = vld [vmem:[%s753_s2 + $0x10] sm:$0xff]  ;;  %v427_v27 = vld [vmem:[%s752_s0 + $0x38] sm:$0xf0] }
   0x9   :  { %83 = vperm.xlu0 %567, %v77_v17   ;;  %v559_v25 = vld [vmem:[%s751_s1 + $0x90] sm:$0xff]  ;;  %93 = vperm.xlu1 %568, %v79_v24   ;;  %v538_v26 = vld [vmem:[%s752_s0 + $0x2c] sm:$0xf]  ;;  %v541_v32 = vld [vmem:[%s751_s1] sm:$0xff] }
   0xa   :  { %298 = vmatpush.bf16.msra.mxu0 %v546_v7  ;;  %v542_v28 = vld [vmem:[%s751_s1 + $0x8] sm:$0xff]  ;;  %v430_v31 = vor.u32 %v538_v26, %v427_v27  ;;  %v549_v33 = vld [vmem:[%s751_s1 + $0x40] sm:$0xff]  ;;  %v80_v35 = vld [vmem:[%s753_s2 + $0x18] sm:$0xff] }
   0xb   :  { %317 = vmatpush.bf16.msra.mxu1 %v554_v8  ;;  %v550_v29 = vld [vmem:[%s751_s1 + $0x48] sm:$0xff]  ;;  %v401_v34 = vld [vmem:[%s752_s0] sm:$0xf]  ;;  %v535_v36 = vld [vmem:[%s752_s0 + $0xc] sm:$0xf0] }
   0xc   :  { %336 = vmatpush.bf16.msra.mxu2 %v562_v10  ;;  %v558_v30 = vld [vmem:[%s751_s1 + $0x88] sm:$0xff]  ;;  %v533_v37 = vld [vmem:[%s752_s0 + $0x4] sm:$0xf]  ;;  %v403_v38 = vld [vmem:[%s752_s0 + $0x10] sm:$0xf0]  ;;  %v402_v42 = vor.u32 %v535_v36, %v401_v34 }
   0xd   :  { %v557_v39 = vld [vmem:[%s751_s1 + $0x80] sm:$0xff]  ;;  %v409_v40 = vld [vmem:[%s752_s0 + $0x8] sm:$0xf]  ;;  %v536_v41 = vld [vmem:[%s752_s0 + $0x14] sm:$0xf0]  ;;  %v406_v43 = vor.u32 %v533_v37, %v403_v38 }
   0xe   :  { %299 = vmatpush.bf16.msra.mxu0 %v545_v14  ;;  %v410_v44 = vor.u32 %v536_v41, %v409_v40  ;;  %v417_v45 = vld [vmem:[%s752_s0 + $0x20] sm:$0xf]  ;;  %v539_v46 = vld [vmem:[%s752_s0 + $0x2c] sm:$0xf0]  ;;  %v537_v47 = vld [vmem:[%s752_s0 + $0x24] sm:$0xf] }
   0xf   :  { %318 = vmatpush.bf16.msra.mxu1 %v553_v15  ;;  %v419_v48 = vld [vmem:[%s752_s0 + $0x30] sm:$0xf0]  ;;  %v425_v49 = vld [vmem:[%s752_s0 + $0x28] sm:$0xf]  ;;  %v540_v50 = vld [vmem:[%s752_s0 + $0x34] sm:$0xf0]  ;;  %v418_v51 = vor.u32 %v539_v46, %v417_v45 }
  0x10   :  { %337 = vmatpush.bf16.msra.mxu2 %v561_v16  ;;  %v422_v52 = vor.u32 %v537_v47, %v419_v48  ;;  %v426_v53 = vor.u32 %v540_v50, %v425_v49 }
  0x11   :  { %88 = vperm.xlu0 %567, %v78_v23   ;;  %98 = vperm.xlu1 %568, %v80_v35  }
  0x12   :  { %300 = vmatpush.bf16.msra.mxu0 %v544_v18 }
  0x13   :  { %319 = vmatpush.bf16.msra.mxu1 %v552_v19 }
  0x14   :  { %338 = vmatpush.bf16.msra.mxu2 %v560_v20 }
  0x16   :  { %301 = vmatpush.bf16.msra.mxu0 %v543_v21 }
  0x17   :  { %320 = vmatpush.bf16.msra.mxu1 %v551_v22 }
  0x18   :  { %339 = vmatpush.bf16.msra.mxu2 %v559_v25  ;;  %532 = vmatmul.msk.bf16.gmra.mxu3 %vm289_vm0, %v430_v31 }
  0x1a   :  { %302 = vmatpush.bf16.msra.mxu0 %v542_v28 }
  0x1b   :  { %321 = vmatpush.bf16.msra.mxu1 %v550_v29 }
  0x1c   :  { %340 = vmatpush.bf16.msra.mxu2 %v558_v30 }
  0x1e   :  { %303 = vmatpush.bf16.msra.mxu0 %v541_v32 }
  0x1f   :  { %322 = vmatpush.bf16.msra.mxu1 %v549_v33 }
  0x20   :  { %341 = vmatpush.bf16.msra.mxu2 %v557_v39 }
  0x21   :  { %304 = vmatmul.bf16.vlgmr.msra.gmra.mxu0 %v402_v42 }
  0x22   :  { %323 = vmatmul.bf16.vlgmr.msra.gmra.mxu1 %v406_v43 }
  0x23   :  { %342 = vmatmul.bf16.vlgmr.msra.gmra.mxu2 %v410_v44 }
  0x31   :  { %309 = vmatmul.bf16.gmra.mxu0 %v418_v51 }
  0x32   :  { %328 = vmatmul.bf16.gmra.mxu1 %v422_v52 }
  0x33   :  { %347 = vmatmul.bf16.gmra.mxu2 %v426_v53 }
  0x7b   :  { %v84_v54 = vpop.permute.xlu0 %83  ;;  %v94_v9 = vpop.permute.xlu1 %93 }
  0x83   :  { %v89_v61 = vpop.permute.xlu0 %88  ;;  %v99_v24 = vpop.permute.xlu1 %98 }
  0x8b   :  { %v362_v58 = vpop.f32.mrf.mxu3 }
  0x93   :  { %v364_v5 = vpop.f32.mrf.mxu3 }
  0x9b   :  { %v367_v20 = vpop.f32.mrf.mxu3 }
  0x9e   :  { %v305_v55 = vpop.f32.mrf.mxu0 }
  0x9f   :  { %v324_v56 = vpop.f32.mrf.mxu1  ;;  %v306_v57 = vadd.f32 %v305_v55, %v84_v54 }
  0xa1   :  { %v325_v59 = vadd.f32 %v324_v56, %v306_v57 }
  0xa3   :  { %v369_v34 = vpop.f32.mrf.mxu3 }
  0xa6   :  { %v343_v60 = vpop.f32.mrf.mxu2  ;;  %v307_v63 = vpop.f32.mrf.mxu0 }
  0xa7   :  { %v344_v62 = vadd.f32 %v343_v60, %v325_v59  ;;  %v326_v1 = vpop.f32.mrf.mxu1  ;;  %v308_v3 = vadd.f32 %v307_v63, %v89_v61 }
  0xa9   :  { %v363_v2 = vadd.f32 %v362_v58, %v344_v62  ;;  %v327_v7 = vadd.f32 %v326_v1, %v308_v3 }
  0xab   :  { %vm373_vm1 = vcmp.ge.f32.partialorder %v363_v2, 0.0  ;;  %v378_v4 = vmul.f32 %v377_v0, %v363_v2 }
  0xad   :  { %v382_v6 = vsel %vm373_vm1, %v363_v2, %v378_v4 }
  0xae   :  { %v386_v8 = vpack.c.bf16 %v382_v6, %v382_v6  ;;  %v345_v10 = vpop.f32.mrf.mxu2  ;;  %v310_v12 = vpop.f32.mrf.mxu0 }
  0xaf   :  { %v346_v11 = vadd.f32 %v345_v10, %v327_v7  ;;  %v311_v13 = vadd.f32 %v310_v12, %v94_v9  ;;  %v329_v15 = vpop.f32.mrf.mxu1 }
  0xb0   :  { %391 = vst.msk [vmem:[%s755_s4] sm:$0xf] %vm390_vm2, %v386_v8 }
  0xb1   :  { %v365_v14 = vadd.f32 %v364_v5, %v346_v11  ;;  %v330_v17 = vadd.f32 %v329_v15, %v311_v13 }
  0xb3   :  { %vm374_vm3 = vcmp.ge.f32.partialorder %v365_v14, 0.0  ;;  %v379_v16 = vmul.f32 %v377_v0, %v365_v14 }
  0xb5   :  { %v383_v18 = vsel %vm374_vm3, %v365_v14, %v379_v16 }
  0xb6   :  { %v387_v19 = vpack.c.bf16 %v383_v18, %v383_v18  ;;  %v348_v21 = vpop.f32.mrf.mxu2  ;;  %v312_v23 = vpop.f32.mrf.mxu0 }
  0xb7   :  { %v349_v22 = vadd.f32 %v348_v21, %v330_v17  ;;  %v313_v26 = vadd.f32 %v312_v23, %v99_v24  ;;  %v331_v28 = vpop.f32.mrf.mxu1 }
  0xb8   :  { %392 = vst.msk [vmem:[%s755_s4 + $0x4] sm:$0xf] %vm390_vm2, %v387_v19 }
  0xb9   :  { %v368_v25 = vadd.f32 %v367_v20, %v349_v22  ;;  %v332_v30 = vadd.f32 %v331_v28, %v313_v26 }
  0xbb   :  { %vm375_vm4 = vcmp.ge.f32.partialorder %v368_v25, 0.0  ;;  %v380_v27 = vmul.f32 %v377_v0, %v368_v25 }
  0xbd   :  { %v384_v29 = vsel %vm375_vm4, %v368_v25, %v380_v27 }
  0xbe   :  { %v388_v31 = vpack.c.bf16 %v384_v29, %v384_v29  ;;  %v350_v32 = vpop.f32.mrf.mxu2 }
  0xbf   :  { %v351_v33 = vadd.f32 %v350_v32, %v332_v30 }
  0xc0   :  { %393 = vst.msk [vmem:[%s755_s4 + $0x8] sm:$0xf] %vm390_vm2, %v388_v31 }
  0xc1   :  { %v370_v35 = vadd.f32 %v369_v34, %v351_v33 }
  0xc3   :  { %vm376_vm5 = vcmp.ge.f32.partialorder %v370_v35, 0.0  ;;  %v381_v36 = vmul.f32 %v377_v0, %v370_v35 }
  0xc5   :  { %v385_v37 = vsel %vm376_vm5, %v370_v35, %v381_v36 }
  0xc6   :  { %v389_v38 = vpack.c.bf16 %v385_v37, %v385_v37 }
  0xc8   :  { %394 = vst.msk [vmem:[%s755_s4 + $0xc] sm:$0xf] %vm390_vm2, %v389_v38 }

// kernel: autoencoder_forward.14
= control target key start
LH: loop header
LB: loop body
LE: loop exit
PB: predicated region body
PF: predicated region fallthrough
CT: control target
= control target key end

     0   :  { %v818_v29 = vmov 0   ;;  %vm456_vm0 = vcmask 261120   ;;  %vm559_vm2 = vcmask 257024   ;;  %s1023_s1 = inlined_call_operand.vmem [shape: bf16[1,800,32], index: 1, kind: input, shape index: {}]   ;;  %s1024_s2 = inlined_call_operand.vmem [shape: f32[8,1], index: 2, kind: input, shape index: {}]   ;;  %s1025_s0 = inlined_call_operand.vmem [shape: bf16[1,8,800], index: 0, kind: input, shape index: {}]   ;;  %s1026_s3 = inlined_call_operand.<no memory space> [shape: f32[1], index: 3, kind: input, shape index: {}]   ;;  %s1027_s4 = inlined_call_operand.vmem [shape: f32[1,8,32], index: 4, kind: input, shape index: {}]   ;;  %s1028_s5 = inlined_call_operand.vmem [shape: bf16[1,8,32], index: 5, kind: output, shape index: {}]  }
   0x1   :  { %v773_v0 = vld [vmem:[%s1023_s1 + $0x38] sm:$0xff]  ;;  %v772_v3 = vld [vmem:[%s1023_s1 + $0x30] sm:$0xff]  ;;  %v771_v8 = vld [vmem:[%s1023_s1 + $0x28] sm:$0xff]  ;;  %817 = vset.pattern.permute.xlu0 %v818_v29 }
   0x2   :  { %v781_v1 = vld [vmem:[%s1023_s1 + $0x78] sm:$0xff]  ;;  %460 = vmatpush.bf16.msra.mxu0 %v773_v0  ;;  %v780_v4 = vld [vmem:[%s1023_s1 + $0x70] sm:$0xff]  ;;  %v779_v9 = vld [vmem:[%s1023_s1 + $0x68] sm:$0xff] }
   0x3   :  { %v789_v2 = vld [vmem:[%s1023_s1 + $0xb8] sm:$0xff]  ;;  %473 = vmatpush.bf16.msra.mxu1 %v781_v1  ;;  %v788_v5 = vld [vmem:[%s1023_s1 + $0xb0] sm:$0xff]  ;;  %v787_v10 = vld [vmem:[%s1023_s1 + $0xa8] sm:$0xff] }
   0x4   :  { %486 = vmatpush.bf16.msra.mxu2 %v789_v2  ;;  %v797_v6 = vld [vmem:[%s1023_s1 + $0xf8] sm:$0xff]  ;;  %v796_v7 = vld [vmem:[%s1023_s1 + $0xf0] sm:$0xff]  ;;  %v795_v11 = vld [vmem:[%s1023_s1 + $0xe8] sm:$0xff] }
   0x5   :  { %499 = vmatpush.bf16.msra.mxu3 %v797_v6  ;;  %v770_v12 = vld [vmem:[%s1023_s1 + $0x20] sm:$0xff]  ;;  %v769_v16 = vld [vmem:[%s1023_s1 + $0x18] sm:$0xff]  ;;  %v768_v20 = vld [vmem:[%s1023_s1 + $0x10] sm:$0xff] }
   0x6   :  { %461 = vmatpush.bf16.msra.mxu0 %v772_v3  ;;  %v778_v13 = vld [vmem:[%s1023_s1 + $0x60] sm:$0xff]  ;;  %v777_v17 = vld [vmem:[%s1023_s1 + $0x58] sm:$0xff]  ;;  %v776_v21 = vld [vmem:[%s1023_s1 + $0x50] sm:$0xff] }
   0x7   :  { %474 = vmatpush.bf16.msra.mxu1 %v780_v4  ;;  %v786_v14 = vld [vmem:[%s1023_s1 + $0xa0] sm:$0xff]  ;;  %v785_v18 = vld [vmem:[%s1023_s1 + $0x98] sm:$0xff]  ;;  %v784_v22 = vld [vmem:[%s1023_s1 + $0x90] sm:$0xff] }
   0x8   :  { %487 = vmatpush.bf16.msra.mxu2 %v788_v5  ;;  %v794_v15 = vld [vmem:[%s1023_s1 + $0xe0] sm:$0xff]  ;;  %v793_v19 = vld [vmem:[%s1023_s1 + $0xd8] sm:$0xff]  ;;  %v792_v23 = vld [vmem:[%s1023_s1 + $0xd0] sm:$0xff] }
   0x9   :  { %500 = vmatpush.bf16.msra.mxu3 %v796_v7  ;;  %v767_v24 = vld [vmem:[%s1023_s1 + $0x8] sm:$0xff]  ;;  %v22_v26 = vld [vmem:[%s1025_s0] sm:$0xff]  ;;  %v805_v36 = vld [vmem:[%s1023_s1 + $0x138] sm:$0xff] }
   0xa   :  { %462 = vmatpush.bf16.msra.mxu0 %v771_v8  ;;  %v775_v25 = vld [vmem:[%s1023_s1 + $0x48] sm:$0xff]  ;;  %v126_v28 = vld [vmem:[%s1024_s2] sm:$0xff]  ;;  %v136_v31 = vunpack.c.l.b16 %v22_v26  ;;  %v137_v33 = vunpack.c.h.b16 %v22_v26  ;;  %v813_v37 = vld [vmem:[%s1023_s1 + $0x178] sm:$0xff] }
   0xb   :  { %475 = vmatpush.bf16.msra.mxu1 %v779_v9  ;;  %v783_v27 = vld [vmem:[%s1023_s1 + $0x88] sm:$0xff]  ;;  %129 = vperm.xlu0 %817, %v126_v28   ;;  %v766_v34 = vld [vmem:[%s1023_s1] sm:$0xff]  ;;  %v804_v45 = vld [vmem:[%s1023_s1 + $0x130] sm:$0xff] }
   0xc   :  { %488 = vmatpush.bf16.msra.mxu2 %v787_v10  ;;  %v23_v30 = vld [vmem:[%s1025_s0 + $0x8] sm:$0xff]  ;;  %v774_v35 = vld [vmem:[%s1023_s1 + $0x40] sm:$0xff]  ;;  %v143_v40 = vpack.c.b16 %v136_v31, %v136_v31  ;;  %v144_v41 = vpack.c.b16 %v137_v33, %v137_v33  ;;  %v812_v46 = vld [vmem:[%s1023_s1 + $0x170] sm:$0xff] }
   0xd   :  { %501 = vmatpush.bf16.msra.mxu3 %v795_v11  ;;  %v791_v32 = vld [vmem:[%s1023_s1 + $0xc8] sm:$0xff]  ;;  %v782_v38 = vld [vmem:[%s1023_s1 + $0x80] sm:$0xff]  ;;  %v138_v39 = vunpack.c.l.b16 %v23_v30  ;;  %v139_v42 = vunpack.c.h.b16 %v23_v30  ;;  %v25_v54 = vld [vmem:[%s1025_s0 + $0x18] sm:$0xf] }
   0xe   :  { %463 = vmatpush.bf16.msra.mxu0 %v770_v12  ;;  %v790_v43 = vld [vmem:[%s1023_s1 + $0xc0] sm:$0xff]  ;;  %v815_v44 = vld [vmem:[%s1023_s1 + $0x188] sm:$0xff]  ;;  %v801_v55 = vld [vmem:[%s1023_s1 + $0x118] sm:$0xff]  ;;  %v142_v57 = vunpack.c.l.b16 %v25_v54 }
   0xf   :  { %476 = vmatpush.bf16.msra.mxu1 %v778_v13  ;;  %v145_v47 = vpack.c.b16 %v138_v39, %v138_v39  ;;  %v146_v48 = vpack.c.b16 %v139_v42, %v139_v42  ;;  %v814_v49 = vld [vmem:[%s1023_s1 + $0x180] sm:$0xff]  ;;  %v803_v50 = vld [vmem:[%s1023_s1 + $0x128] sm:$0xff]  ;;  %v809_v56 = vld [vmem:[%s1023_s1 + $0x158] sm:$0xff] }
  0x10   :  { %489 = vmatpush.bf16.msra.mxu2 %v786_v14  ;;  %v811_v51 = vld [vmem:[%s1023_s1 + $0x168] sm:$0xff]  ;;  %v802_v52 = vld [vmem:[%s1023_s1 + $0x120] sm:$0xff]  ;;  %v800_v58 = vld [vmem:[%s1023_s1 + $0x110] sm:$0xff]  ;;  %v149_v60 = vpack.c.b16 %v142_v57, %v142_v57 }
  0x11   :  { %502 = vmatpush.bf16.msra.mxu3 %v794_v15  ;;  %v810_v53 = vld [vmem:[%s1023_s1 + $0x160] sm:$0xff]  ;;  %v808_v59 = vld [vmem:[%s1023_s1 + $0x150] sm:$0xff]  ;;  %v799_v61 = vld [vmem:[%s1023_s1 + $0x108] sm:$0xff] }
  0x12   :  { %464 = vmatpush.bf16.msra.mxu0 %v769_v16  ;;  %v807_v62 = vld [vmem:[%s1023_s1 + $0x148] sm:$0xff]  ;;  %v24_v63 = vld [vmem:[%s1025_s0 + $0x10] sm:$0xff]  ;;  %v798_v2 = vld [vmem:[%s1023_s1 + $0x100] sm:$0xff] }
  0x13   :  { %477 = vmatpush.bf16.msra.mxu1 %v777_v17  ;;  %v140_v0 = vunpack.c.l.b16 %v24_v63  ;;  %v141_v1 = vunpack.c.h.b16 %v24_v63  ;;  %v806_v3 = vld [vmem:[%s1023_s1 + $0x140] sm:$0xff] }
  0x14   :  { %490 = vmatpush.bf16.msra.mxu2 %v785_v18  ;;  %v556_v28 = vld [vmem:[%s1027_s4] sm:$0xff] }
  0x15   :  { %503 = vmatpush.bf16.msra.mxu3 %v793_v19  ;;  %v147_v4 = vpack.c.b16 %v140_v0, %v140_v0  ;;  %v148_v5 = vpack.c.b16 %v141_v1, %v141_v1 }
  0x16   :  { %465 = vmatpush.bf16.msra.mxu0 %v768_v20 }
  0x17   :  { %478 = vmatpush.bf16.msra.mxu1 %v776_v21 }
  0x18   :  { %491 = vmatpush.bf16.msra.mxu2 %v784_v22 }
  0x19   :  { %504 = vmatpush.bf16.msra.mxu3 %v792_v23 }
  0x1a   :  { %466 = vmatpush.bf16.msra.mxu0 %v767_v24  ;;  %v553_v24 = vstv %s1026_s3 }
  0x1b   :  { %479 = vmatpush.bf16.msra.mxu1 %v775_v25 }
  0x1c   :  { %492 = vmatpush.bf16.msra.mxu2 %v783_v27 }
  0x1d   :  { %505 = vmatpush.bf16.msra.mxu3 %v791_v32 }
  0x1e   :  { %467 = vmatpush.bf16.msra.mxu0 %v766_v34 }
  0x1f   :  { %480 = vmatpush.bf16.msra.mxu1 %v774_v35 }
  0x20   :  { %493 = vmatpush.bf16.msra.mxu2 %v782_v38 }
  0x21   :  { %468 = vmatmul.bf16.vlgmr.msra.gmra.mxu0 %v143_v40  ;;  %506 = vmatpush.bf16.msra.mxu3 %v790_v43 }
  0x22   :  { %512 = vmatpush.bf16.msrb.mxu0 %v805_v36  ;;  %481 = vmatmul.bf16.vlgmr.msra.gmra.mxu1 %v144_v41 }
  0x23   :  { %525 = vmatpush.bf16.msrb.mxu1 %v813_v37  ;;  %494 = vmatmul.bf16.vlgmr.msra.gmra.mxu2 %v145_v47 }
  0x24   :  { %544 = vmatpush.bf16.msrb.mxu2 %v815_v44  ;;  %507 = vmatmul.bf16.vlgmr.msra.gmra.mxu3 %v146_v48 }
  0x26   :  { %513 = vmatpush.bf16.msrb.mxu0 %v804_v45 }
  0x27   :  { %526 = vmatpush.bf16.msrb.mxu1 %v812_v46 }
  0x28   :  { %545 = vmatpush.bf16.msrb.mxu2 %v814_v49 }
  0x2a   :  { %514 = vmatpush.bf16.msrb.mxu0 %v803_v50 }
  0x2b   :  { %527 = vmatpush.bf16.msrb.mxu1 %v811_v51 }
  0x2e   :  { %515 = vmatpush.bf16.msrb.mxu0 %v802_v52 }
  0x2f   :  { %528 = vmatpush.bf16.msrb.mxu1 %v810_v53 }
  0x32   :  { %516 = vmatpush.bf16.msrb.mxu0 %v801_v55 }
  0x33   :  { %529 = vmatpush.bf16.msrb.mxu1 %v809_v56  ;;  %765 = vmatmul.msk.bf16.vlgmr.msrb.gmra.mxu2 %vm456_vm0, %v149_v60 }
  0x36   :  { %517 = vmatpush.bf16.msrb.mxu0 %v800_v58 }
  0x37   :  { %530 = vmatpush.bf16.msrb.mxu1 %v808_v59 }
  0x3a   :  { %518 = vmatpush.bf16.msrb.mxu0 %v799_v61 }
  0x3b   :  { %531 = vmatpush.bf16.msrb.mxu1 %v807_v62 }
  0x3e   :  { %519 = vmatpush.bf16.msrb.mxu0 %v798_v2 }
  0x3f   :  { %532 = vmatpush.bf16.msrb.mxu1 %v806_v3 }
  0x41   :  { %520 = vmatmul.bf16.vlgmr.msrb.gmra.mxu0 %v147_v4 }
  0x42   :  { %533 = vmatmul.bf16.vlgmr.msrb.gmra.mxu1 %v148_v5 }
  0x7d   :  { %v130_v12 = vpop.permute.xlu0 %129 }
  0x9e   :  { %v469_v6 = vpop.f32.mrf.mxu0 }
  0x9f   :  { %v482_v7 = vpop.f32.mrf.mxu1  ;;  %v470_v13 = vadd.f32 %v469_v6, %v130_v12 }
  0xa1   :  { %v483_v16 = vadd.f32 %v482_v7, %v470_v13 }
  0xa6   :  { %v471_v8 = vpop.f32.mrf.mxu0  ;;  %v495_v10 = vpop.f32.mrf.mxu2 }
  0xa7   :  { %v484_v9 = vpop.f32.mrf.mxu1  ;;  %v508_v11 = vpop.f32.mrf.mxu3  ;;  %v496_v17 = vadd.f32 %v495_v10, %v483_v16 }
  0xa9   :  { %v509_v19 = vadd.f32 %v508_v11, %v496_v17 }
  0xae   :  { %v497_v14 = vpop.f32.mrf.mxu2 }
  0xaf   :  { %v510_v15 = vpop.f32.mrf.mxu3 }
  0xb6   :  { %v547_v18 = vpop.f32.mrf.mxu2 }
  0xbe   :  { %v521_v20 = vpop.f32.mrf.mxu0  ;;  %v549_v25 = vpop.f32.mrf.mxu2 }
  0xbf   :  { %v534_v21 = vpop.f32.mrf.mxu1  ;;  %v522_v22 = vadd.f32 %v521_v20, %v509_v19 }
  0xc1   :  { %v535_v23 = vadd.f32 %v534_v21, %v522_v22 }
  0xc3   :  { %v548_v26 = vadd.f32 %v547_v18, %v535_v23 }
  0xc5   :  { %vm552_vm1 = vcmp.ge.f32.partialorder %v548_v26, 0.0  ;;  %v554_v27 = vmul.f32 %v553_v24, %v548_v26 }
  0xc6   :  { %v523_v29 = vpop.f32.mrf.mxu0 }
  0xc7   :  { %v536_v30 = vpop.f32.mrf.mxu1  ;;  %v555_v31 = vsel %vm552_vm1, %v548_v26, %v554_v27 }
  0xc8   :  { %v557_v32 = vadd.f32 %v556_v28, %v555_v31 }
  0xca   :  { %v558_v33 = vpack.c.bf16 %v557_v32, %v557_v32 }
  0xcc   :  { %560 = vst.msk [vmem:[%s1028_s5] sm:$0xf] %vm559_vm2, %v558_v33 }

// kernel: autoencoder_forward.12
= control target key start
LH: loop header
LB: loop body
LE: loop exit
PB: predicated region body
PF: predicated region fallthrough
CT: control target
= control target key end

     0   :  { %v1029_v21 = vmov 0   ;;  %vm529_vm0 = vcmask 261120   ;;  %vm687_vm2 = vcmask 257024   ;;  %s1320_s1 = inlined_call_operand.vmem [shape: bf16[1,800,32], index: 1, kind: input, shape index: {}]   ;;  %s1321_s2 = inlined_call_operand.vmem [shape: f32[32,1], index: 2, kind: input, shape index: {}]   ;;  %s1322_s0 = inlined_call_operand.vmem [shape: bf16[1,32,800], index: 0, kind: input, shape index: {}]   ;;  %s1323_s3 = inlined_call_operand.<no memory space> [shape: f32[1], index: 3, kind: input, shape index: {}]   ;;  %s1324_s4 = inlined_call_operand.vmem [shape: bf16[1,32,32], index: 4, kind: output, shape index: {}]  }
   0x1   :  { %v975_v0 = vld [vmem:[%s1320_s1 + $0x38] sm:$0xff]  ;;  %v974_v4 = vld [vmem:[%s1320_s1 + $0x30] sm:$0xff]  ;;  %v973_v8 = vld [vmem:[%s1320_s1 + $0x28] sm:$0xff]  ;;  %1027 = vset.pattern.permute.xlu0 %v1029_v21  ;;  %1028 = vset.pattern.permute.xlu1 %v1029_v21 }
   0x2   :  { %v983_v1 = vld [vmem:[%s1320_s1 + $0x78] sm:$0xff]  ;;  %536 = vmatpush.bf16.msra.mxu0 %v975_v0  ;;  %v982_v5 = vld [vmem:[%s1320_s1 + $0x70] sm:$0xff]  ;;  %v981_v9 = vld [vmem:[%s1320_s1 + $0x68] sm:$0xff] }
   0x3   :  { %v991_v2 = vld [vmem:[%s1320_s1 + $0xb8] sm:$0xff]  ;;  %555 = vmatpush.bf16.msra.mxu1 %v983_v1  ;;  %v990_v6 = vld [vmem:[%s1320_s1 + $0xb0] sm:$0xff]  ;;  %v989_v10 = vld [vmem:[%s1320_s1 + $0xa8] sm:$0xff] }
   0x4   :  { %v999_v3 = vld [vmem:[%s1320_s1 + $0xf8] sm:$0xff]  ;;  %574 = vmatpush.bf16.msra.mxu2 %v991_v2  ;;  %v998_v7 = vld [vmem:[%s1320_s1 + $0xf0] sm:$0xff]  ;;  %v997_v11 = vld [vmem:[%s1320_s1 + $0xe8] sm:$0xff] }
   0x5   :  { %593 = vmatpush.bf16.msra.mxu3 %v999_v3  ;;  %v972_v12 = vld [vmem:[%s1320_s1 + $0x20] sm:$0xff]  ;;  %v971_v16 = vld [vmem:[%s1320_s1 + $0x18] sm:$0xff]  ;;  %v970_v22 = vld [vmem:[%s1320_s1 + $0x10] sm:$0xff] }
   0x6   :  { %537 = vmatpush.bf16.msra.mxu0 %v974_v4  ;;  %v980_v13 = vld [vmem:[%s1320_s1 + $0x60] sm:$0xff]  ;;  %v979_v17 = vld [vmem:[%s1320_s1 + $0x58] sm:$0xff]  ;;  %v978_v23 = vld [vmem:[%s1320_s1 + $0x50] sm:$0xff] }
   0x7   :  { %556 = vmatpush.bf16.msra.mxu1 %v982_v5  ;;  %v988_v14 = vld [vmem:[%s1320_s1 + $0xa0] sm:$0xff]  ;;  %v987_v18 = vld [vmem:[%s1320_s1 + $0x98] sm:$0xff]  ;;  %v986_v24 = vld [vmem:[%s1320_s1 + $0x90] sm:$0xff] }
   0x8   :  { %575 = vmatpush.bf16.msra.mxu2 %v990_v6  ;;  %v996_v15 = vld [vmem:[%s1320_s1 + $0xe0] sm:$0xff]  ;;  %v995_v19 = vld [vmem:[%s1320_s1 + $0xd8] sm:$0xff]  ;;  %v994_v25 = vld [vmem:[%s1320_s1 + $0xd0] sm:$0xff] }
   0x9   :  { %594 = vmatpush.bf16.msra.mxu3 %v998_v7  ;;  %v135_v20 = vld [vmem:[%s1321_s2] sm:$0xff]  ;;  %v969_v26 = vld [vmem:[%s1320_s1 + $0x8] sm:$0xff]  ;;  %v957_v36 = vld [vmem:[%s1322_s0 + $0x18] sm:$0xf0] }
   0xa   :  { %538 = vmatpush.bf16.msra.mxu0 %v973_v8  ;;  %141 = vperm.xlu0 %1027, %v135_v20   ;;  %v977_v27 = vld [vmem:[%s1320_s1 + $0x48] sm:$0xff]  ;;  %v968_v31 = vld [vmem:[%s1320_s1] sm:$0xff]  ;;  %v137_v43 = vld [vmem:[%s1321_s2 + $0x10] sm:$0xff] }
   0xb   :  { %557 = vmatpush.bf16.msra.mxu1 %v981_v9  ;;  %v136_v28 = vld [vmem:[%s1321_s2 + $0x8] sm:$0xff]  ;;  %v976_v32 = vld [vmem:[%s1320_s1 + $0x40] sm:$0xff]  ;;  %v1007_v45 = vld [vmem:[%s1320_s1 + $0x138] sm:$0xff]  ;;  %151 = vperm.xlu1 %1028, %v137_v43  }
   0xc   :  { %576 = vmatpush.bf16.msra.mxu2 %v989_v10  ;;  %v985_v29 = vld [vmem:[%s1320_s1 + $0x88] sm:$0xff]  ;;  %v984_v33 = vld [vmem:[%s1320_s1 + $0x80] sm:$0xff]  ;;  %v1015_v50 = vld [vmem:[%s1320_s1 + $0x178] sm:$0xff] }
   0xd   :  { %595 = vmatpush.bf16.msra.mxu3 %v997_v11  ;;  %v993_v30 = vld [vmem:[%s1320_s1 + $0xc8] sm:$0xff]  ;;  %v992_v34 = vld [vmem:[%s1320_s1 + $0xc0] sm:$0xff]  ;;  %v1006_v51 = vld [vmem:[%s1320_s1 + $0x130] sm:$0xff] }
   0xe   :  { %539 = vmatpush.bf16.msra.mxu0 %v972_v12  ;;  %v698_v35 = vld [vmem:[%s1322_s0] sm:$0xf]  ;;  %v954_v37 = vld [vmem:[%s1322_s0 + $0x4] sm:$0xf]  ;;  %v706_v39 = vld [vmem:[%s1322_s0 + $0x8] sm:$0xf] }
   0xf   :  { %558 = vmatpush.bf16.msra.mxu1 %v980_v13  ;;  %v700_v38 = vld [vmem:[%s1322_s0 + $0x1c] sm:$0xf0]  ;;  %v958_v40 = vld [vmem:[%s1322_s0 + $0x20] sm:$0xf0]  ;;  %v955_v41 = vld [vmem:[%s1322_s0 + $0xc] sm:$0xf]  ;;  %v699_v46 = vor.u32 %v957_v36, %v698_v35 }
  0x10   :  { %577 = vmatpush.bf16.msra.mxu2 %v988_v14  ;;  %v708_v42 = vld [vmem:[%s1322_s0 + $0x24] sm:$0xf0]  ;;  %v703_v47 = vor.u32 %v954_v37, %v700_v38  ;;  %v707_v48 = vor.u32 %v958_v40, %v706_v39  ;;  %v1016_v52 = vld [vmem:[%s1320_s1 + $0x180] sm:$0xff]  ;;  %v1014_v53 = vld [vmem:[%s1320_s1 + $0x170] sm:$0xff] }
  0x11   :  { %596 = vmatpush.bf16.msra.mxu3 %v996_v15  ;;  %v1017_v44 = vld [vmem:[%s1320_s1 + $0x188] sm:$0xff]  ;;  %v711_v49 = vor.u32 %v955_v41, %v708_v42  ;;  %v138_v54 = vld [vmem:[%s1321_s2 + $0x18] sm:$0xff]  ;;  %v1004_v57 = vld [vmem:[%s1320_s1 + $0x120] sm:$0xff] }
  0x12   :  { %540 = vmatpush.bf16.msra.mxu0 %v971_v16  ;;  %146 = vperm.xlu0 %1027, %v136_v28   ;;  %v1005_v55 = vld [vmem:[%s1320_s1 + $0x128] sm:$0xff]  ;;  %v1012_v58 = vld [vmem:[%s1320_s1 + $0x160] sm:$0xff]  ;;  %v726_v59 = vld [vmem:[%s1322_s0 + $0x38] sm:$0xf] }
  0x13   :  { %559 = vmatpush.bf16.msra.mxu1 %v979_v17  ;;  %156 = vperm.xlu1 %1028, %v138_v54   ;;  %v1013_v56 = vld [vmem:[%s1320_s1 + $0x168] sm:$0xff]  ;;  %v964_v60 = vld [vmem:[%s1322_s0 + $0x50] sm:$0xf0]  ;;  %v961_v61 = vld [vmem:[%s1322_s0 + $0x3c] sm:$0xf] }
  0x14   :  { %578 = vmatpush.bf16.msra.mxu2 %v987_v18  ;;  %v728_v62 = vld [vmem:[%s1322_s0 + $0x54] sm:$0xf0]  ;;  %v734_v63 = vld [vmem:[%s1322_s0 + $0x40] sm:$0xf]  ;;  %v965_v0 = vld [vmem:[%s1322_s0 + $0x58] sm:$0xf0]  ;;  %v727_v4 = vor.u32 %v964_v60, %v726_v59 }
  0x15   :  { %597 = vmatpush.bf16.msra.mxu3 %v995_v19  ;;  %v962_v1 = vld [vmem:[%s1322_s0 + $0x44] sm:$0xf]  ;;  %v736_v2 = vld [vmem:[%s1322_s0 + $0x5c] sm:$0xf0]  ;;  %v1003_v3 = vld [vmem:[%s1320_s1 + $0x118] sm:$0xff]  ;;  %v731_v5 = vor.u32 %v961_v61, %v728_v62  ;;  %v735_v6 = vor.u32 %v965_v0, %v734_v63 }
  0x16   :  { %541 = vmatpush.bf16.msra.mxu0 %v970_v22  ;;  %v739_v7 = vor.u32 %v962_v1, %v736_v2  ;;  %v1011_v8 = vld [vmem:[%s1320_s1 + $0x158] sm:$0xff]  ;;  %v1002_v9 = vld [vmem:[%s1320_s1 + $0x110] sm:$0xff]  ;;  %v1001_v11 = vld [vmem:[%s1320_s1 + $0x108] sm:$0xff]  ;;  %v674_v1 = vstv %s1323_s3 }
  0x17   :  { %560 = vmatpush.bf16.msra.mxu1 %v978_v23  ;;  %v1010_v10 = vld [vmem:[%s1320_s1 + $0x150] sm:$0xff]  ;;  %v1009_v12 = vld [vmem:[%s1320_s1 + $0x148] sm:$0xff]  ;;  %v1000_v13 = vld [vmem:[%s1320_s1 + $0x100] sm:$0xff] }
  0x18   :  { %579 = vmatpush.bf16.msra.mxu2 %v986_v24  ;;  %v1008_v14 = vld [vmem:[%s1320_s1 + $0x140] sm:$0xff]  ;;  %v714_v15 = vld [vmem:[%s1322_s0 + $0x10] sm:$0xf]  ;;  %v959_v16 = vld [vmem:[%s1322_s0 + $0x28] sm:$0xf0] }
  0x19   :  { %598 = vmatpush.bf16.msra.mxu3 %v994_v25  ;;  %v742_v17 = vld [vmem:[%s1322_s0 + $0x48] sm:$0xf]  ;;  %v966_v18 = vld [vmem:[%s1322_s0 + $0x60] sm:$0xf0]  ;;  %v956_v19 = vld [vmem:[%s1322_s0 + $0x14] sm:$0xf]  ;;  %v715_v23 = vor.u32 %v959_v16, %v714_v15 }
  0x1a   :  { %542 = vmatpush.bf16.msra.mxu0 %v969_v26  ;;  %v716_v20 = vld [vmem:[%s1322_s0 + $0x2c] sm:$0xf0]  ;;  %v722_v21 = vld [vmem:[%s1322_s0 + $0x18] sm:$0xf]  ;;  %v960_v22 = vld [vmem:[%s1322_s0 + $0x30] sm:$0xf0]  ;;  %v743_v24 = vor.u32 %v966_v18, %v742_v17 }
  0x1b   :  { %561 = vmatpush.bf16.msra.mxu1 %v977_v27  ;;  %v719_v25 = vor.u32 %v956_v19, %v716_v20  ;;  %v723_v26 = vor.u32 %v960_v22, %v722_v21  ;;  %v963_v27 = vld [vmem:[%s1322_s0 + $0x4c] sm:$0xf]  ;;  %v744_v28 = vld [vmem:[%s1322_s0 + $0x64] sm:$0xf0] }
  0x1c   :  { %580 = vmatpush.bf16.msra.mxu2 %v985_v29  ;;  %v750_v29 = vld [vmem:[%s1322_s0 + $0x50] sm:$0xf] }
  0x1d   :  { %599 = vmatpush.bf16.msra.mxu3 %v993_v30  ;;  %v967_v30 = vld [vmem:[%s1322_s0 + $0x68] sm:$0xf0] }
  0x1e   :  { %543 = vmatpush.bf16.msra.mxu0 %v968_v31  ;;  %v747_v31 = vor.u32 %v963_v27, %v744_v28 }
  0x1f   :  { %562 = vmatpush.bf16.msra.mxu1 %v976_v32  ;;  %v751_v32 = vor.u32 %v967_v30, %v750_v29 }
  0x20   :  { %581 = vmatpush.bf16.msra.mxu2 %v984_v33 }
  0x21   :  { %600 = vmatpush.bf16.msra.mxu3 %v992_v34  ;;  %544 = vmatmul.bf16.vlgmr.msra.gmra.mxu0 %v699_v46 }
  0x22   :  { %612 = vmatpush.bf16.msrb.mxu0 %v1007_v45  ;;  %563 = vmatmul.bf16.vlgmr.msra.gmra.mxu1 %v703_v47 }
  0x23   :  { %582 = vmatmul.bf16.vlgmr.msra.gmra.mxu2 %v707_v48  ;;  %631 = vmatpush.bf16.msrb.mxu1 %v1015_v50 }
  0x24   :  { %656 = vmatpush.bf16.msrb.mxu2 %v1017_v44  ;;  %601 = vmatmul.bf16.vlgmr.msra.gmra.mxu3 %v711_v49 }
  0x25   :  { %1018 = vmatpush.bf16.msrb.mxu3 %v1007_v45 }
  0x26   :  { %613 = vmatpush.bf16.msrb.mxu0 %v1006_v51 }
  0x27   :  { %632 = vmatpush.bf16.msrb.mxu1 %v1014_v53 }
  0x28   :  { %657 = vmatpush.bf16.msrb.mxu2 %v1016_v52 }
  0x29   :  { %1019 = vmatpush.bf16.msrb.mxu3 %v1006_v51 }
  0x2a   :  { %614 = vmatpush.bf16.msrb.mxu0 %v1005_v55 }
  0x2b   :  { %633 = vmatpush.bf16.msrb.mxu1 %v1013_v56 }
  0x2d   :  { %1020 = vmatpush.bf16.msrb.mxu3 %v1005_v55 }
  0x2e   :  { %615 = vmatpush.bf16.msrb.mxu0 %v1004_v57 }
  0x2f   :  { %634 = vmatpush.bf16.msrb.mxu1 %v1012_v58 }
  0x31   :  { %1021 = vmatpush.bf16.msrb.mxu3 %v1004_v57  ;;  %549 = vmatmul.bf16.gmra.mxu0 %v727_v4 }
  0x32   :  { %616 = vmatpush.bf16.msrb.mxu0 %v1003_v3  ;;  %568 = vmatmul.bf16.gmra.mxu1 %v731_v5 }
  0x33   :  { %587 = vmatmul.bf16.gmra.mxu2 %v735_v6  ;;  %635 = vmatpush.bf16.msrb.mxu1 %v1011_v8 }
  0x34   :  { %606 = vmatmul.bf16.gmra.mxu3 %v739_v7 }
  0x35   :  { %1022 = vmatpush.bf16.msrb.mxu3 %v1003_v3 }
  0x36   :  { %617 = vmatpush.bf16.msrb.mxu0 %v1002_v9 }
  0x37   :  { %636 = vmatpush.bf16.msrb.mxu1 %v1010_v10 }
  0x39   :  { %1023 = vmatpush.bf16.msrb.mxu3 %v1002_v9 }
  0x3a   :  { %618 = vmatpush.bf16.msrb.mxu0 %v1001_v11 }
  0x3b   :  { %637 = vmatpush.bf16.msrb.mxu1 %v1009_v12 }
  0x3d   :  { %1024 = vmatpush.bf16.msrb.mxu3 %v1001_v11 }
  0x3e   :  { %619 = vmatpush.bf16.msrb.mxu0 %v1000_v13 }
  0x3f   :  { %638 = vmatpush.bf16.msrb.mxu1 %v1008_v14 }
  0x41   :  { %1025 = vmatpush.bf16.msrb.mxu3 %v1000_v13  ;;  %620 = vmatmul.bf16.vlgmr.msrb.gmra.mxu0 %v715_v23 }
  0x42   :  { %639 = vmatmul.bf16.vlgmr.msrb.gmra.mxu1 %v719_v25 }
  0x43   :  { %952 = vmatmul.msk.bf16.vlgmr.msrb.gmra.mxu2 %vm529_vm0, %v723_v26 }
  0x44   :  { %625 = vmatmul.bf16.vlgmr.msrb.gmra.mxu3 %v743_v24 }
  0x52   :  { %644 = vmatmul.bf16.gmra.mxu1 %v747_v31 }
  0x53   :  { %953 = vmatmul.msk.bf16.gmra.mxu2 %vm529_vm0, %v751_v32 }
  0x7c   :  { %v142_v42 = vpop.permute.xlu0 %141 }
  0x7d   :  { %v152_v59 = vpop.permute.xlu1 %151 }
  0x84   :  { %v147_v49 = vpop.permute.xlu0 %146 }
  0x85   :  { %v157_v10 = vpop.permute.xlu1 %156 }
  0x9e   :  { %v545_v33 = vpop.f32.mrf.mxu0 }
  0x9f   :  { %v564_v34 = vpop.f32.mrf.mxu1  ;;  %v546_v44 = vadd.f32 %v545_v33, %v142_v42 }
  0xa1   :  { %v565_v48 = vadd.f32 %v564_v34, %v546_v44 }
  0xa6   :  { %v583_v35 = vpop.f32.mrf.mxu2  ;;  %v547_v37 = vpop.f32.mrf.mxu0 }
  0xa7   :  { %v602_v36 = vpop.f32.mrf.mxu3  ;;  %v566_v38 = vpop.f32.mrf.mxu1  ;;  %v584_v51 = vadd.f32 %v583_v35, %v565_v48  ;;  %v548_v52 = vadd.f32 %v547_v37, %v147_v49 }
  0xa9   :  { %v603_v55 = vadd.f32 %v602_v36, %v584_v51  ;;  %v567_v57 = vadd.f32 %v566_v38, %v548_v52 }
  0xae   :  { %v585_v39 = vpop.f32.mrf.mxu2  ;;  %v550_v40 = vpop.f32.mrf.mxu0 }
  0xaf   :  { %v569_v41 = vpop.f32.mrf.mxu1  ;;  %v604_v43 = vpop.f32.mrf.mxu3  ;;  %v586_v60 = vadd.f32 %v585_v39, %v567_v57  ;;  %v551_v62 = vadd.f32 %v550_v40, %v152_v59 }
  0xb1   :  { %v605_v3 = vadd.f32 %v604_v43, %v586_v60  ;;  %v570_v6 = vadd.f32 %v569_v41, %v551_v62 }
  0xb6   :  { %v588_v45 = vpop.f32.mrf.mxu2  ;;  %v552_v46 = vpop.f32.mrf.mxu0 }
  0xb7   :  { %v571_v47 = vpop.f32.mrf.mxu1  ;;  %v607_v50 = vpop.f32.mrf.mxu3  ;;  %v589_v12 = vadd.f32 %v588_v45, %v570_v6  ;;  %v553_v16 = vadd.f32 %v552_v46, %v157_v10 }
  0xb9   :  { %v608_v19 = vadd.f32 %v607_v50, %v589_v12  ;;  %v572_v21 = vadd.f32 %v571_v47, %v553_v16 }
  0xbe   :  { %v590_v53 = vpop.f32.mrf.mxu2  ;;  %v621_v54 = vpop.f32.mrf.mxu0 }
  0xbf   :  { %v640_v56 = vpop.f32.mrf.mxu1  ;;  %v622_v58 = vadd.f32 %v621_v54, %v603_v55  ;;  %v609_v61 = vpop.f32.mrf.mxu3  ;;  %v591_v25 = vadd.f32 %v590_v53, %v572_v21 }
  0xc1   :  { %v641_v63 = vadd.f32 %v640_v56, %v622_v58  ;;  %v610_v30 = vadd.f32 %v609_v61, %v591_v25 }
  0xc6   :  { %v659_v0 = vpop.f32.mrf.mxu2  ;;  %v623_v2 = vpop.f32.mrf.mxu0 }
  0xc7   :  { %v660_v4 = vadd.f32 %v659_v0, %v641_v63  ;;  %v642_v5 = vpop.f32.mrf.mxu1  ;;  %v624_v8 = vadd.f32 %v623_v2, %v605_v3  ;;  %v626_v14 = vpop.f32.mrf.mxu3 }
  0xc8   :  { %v627_v22 = vadd.f32 %v626_v14, %v608_v19 }
  0xc9   :  { %vm670_vm1 = vcmp.ge.f32.partialorder %v660_v4, 0.0  ;;  %v675_v7 = vmul.f32 %v674_v1, %v660_v4  ;;  %v643_v13 = vadd.f32 %v642_v5, %v624_v8 }
  0xcb   :  { %v679_v9 = vsel %vm670_vm1, %v660_v4, %v675_v7 }
  0xcc   :  { %v683_v11 = vpack.c.bf16 %v679_v9, %v679_v9 }
  0xce   :  { %688 = vst.msk [vmem:[%s1324_s4] sm:$0xf] %vm687_vm2, %v683_v11  ;;  %v661_v15 = vpop.f32.mrf.mxu2 }
  0xcf   :  { %v662_v17 = vadd.f32 %v661_v15, %v643_v13  ;;  %v645_v18 = vpop.f32.mrf.mxu1  ;;  %v628_v29 = vpop.f32.mrf.mxu3 }
  0xd0   :  { %v646_v26 = vadd.f32 %v645_v18, %v627_v22  ;;  %v629_v33 = vadd.f32 %v628_v29, %v610_v30 }
  0xd1   :  { %vm671_vm3 = vcmp.ge.f32.partialorder %v662_v17, 0.0  ;;  %v676_v20 = vmul.f32 %v674_v1, %v662_v17 }
  0xd3   :  { %v680_v23 = vsel %vm671_vm3, %v662_v17, %v676_v20 }
  0xd4   :  { %v684_v24 = vpack.c.bf16 %v680_v23, %v680_v23 }
  0xd6   :  { %689 = vst.msk [vmem:[%s1324_s4 + $0x4] sm:$0xf] %vm687_vm2, %v684_v24  ;;  %v664_v27 = vpop.f32.mrf.mxu2 }
  0xd7   :  { %v665_v28 = vadd.f32 %v664_v27, %v646_v26  ;;  %v647_v32 = vpop.f32.mrf.mxu1 }
  0xd8   :  { %v648_v36 = vadd.f32 %v647_v32, %v629_v33 }
  0xd9   :  { %vm672_vm4 = vcmp.ge.f32.partialorder %v665_v28, 0.0  ;;  %v677_v31 = vmul.f32 %v674_v1, %v665_v28 }
  0xdb   :  { %v681_v34 = vsel %vm672_vm4, %v665_v28, %v677_v31 }
  0xdc   :  { %v685_v35 = vpack.c.bf16 %v681_v34, %v681_v34 }
  0xde   :  { %690 = vst.msk [vmem:[%s1324_s4 + $0x8] sm:$0xf] %vm687_vm2, %v685_v35  ;;  %v666_v37 = vpop.f32.mrf.mxu2 }
  0xdf   :  { %v667_v38 = vadd.f32 %v666_v37, %v648_v36 }
  0xe1   :  { %vm673_vm5 = vcmp.ge.f32.partialorder %v667_v38, 0.0  ;;  %v678_v39 = vmul.f32 %v674_v1, %v667_v38 }
  0xe3   :  { %v682_v40 = vsel %vm673_vm5, %v667_v38, %v678_v39 }
  0xe4   :  { %v686_v41 = vpack.c.bf16 %v682_v40, %v682_v40 }
  0xe6   :  { %691 = vst.msk [vmem:[%s1324_s4 + $0xc] sm:$0xf] %vm687_vm2, %v686_v41 }

// kernel: autoencoder_forward.15
= control target key start
LH: loop header
LB: loop body
LE: loop exit
PB: predicated region body
PF: predicated region fallthrough
CT: control target
= control target key end

     0   :  { %v344_v4 = vmov 0   ;;  %vm169_vm0 = vcmask 654336   ;;  %vm232_vm2 = vcmask 257024   ;;  %s464_s1 = inlined_call_operand.vmem [shape: bf16[1,208,32], index: 1, kind: input, shape index: {}]   ;;  %s465_s2 = inlined_call_operand.vmem [shape: f32[32,1], index: 2, kind: input, shape index: {}]   ;;  %s466_s0 = inlined_call_operand.vmem [shape: bf16[1,32,208], index: 0, kind: input, shape index: {}]   ;;  %s467_s3 = inlined_call_operand.<no memory space> [shape: f32[1], index: 3, kind: input, shape index: {}]   ;;  %s468_s4 = inlined_call_operand.vmem [shape: bf16[1,32,32], index: 4, kind: output, shape index: {}]  }
   0x1   :  { %v322_v0 = vld [vmem:[%s464_s1 + $0x38] sm:$0xff]  ;;  %v327_v1 = vld [vmem:[%s464_s1 + $0x60] sm:$0xff]  ;;  %v321_v2 = vld [vmem:[%s464_s1 + $0x30] sm:$0xff]  ;;  %343 = vset.pattern.permute.xlu1 %v344_v4  ;;  %342 = vset.pattern.permute.xlu0 %v344_v4  ;;  %v219_v34 = vstv %s467_s3 }
   0x2   :  { %176 = vmatpush.bf16.msra.mxu0 %v322_v0  ;;  %328 = vmatpush.bf16.msra.mxu2 %v322_v0  ;;  %v326_v3 = vld [vmem:[%s464_s1 + $0x58] sm:$0xff]  ;;  %v320_v5 = vld [vmem:[%s464_s1 + $0x28] sm:$0xff]  ;;  %v325_v6 = vld [vmem:[%s464_s1 + $0x50] sm:$0xff] }
   0x3   :  { %336 = vmatpush.bf16.msra.mxu3 %v327_v1  ;;  %198 = vmatpush.bf16.msra.mxu1 %v327_v1  ;;  %v51_v7 = vld [vmem:[%s465_s2 + $0x10] sm:$0xff]  ;;  %v49_v8 = vld [vmem:[%s465_s2] sm:$0xff]  ;;  %v324_v10 = vld [vmem:[%s464_s1 + $0x48] sm:$0xff] }
   0x4   :  { %65 = vperm.xlu1 %343, %v51_v7   ;;  %55 = vperm.xlu0 %342, %v49_v8   ;;  %v319_v9 = vld [vmem:[%s464_s1 + $0x20] sm:$0xff]  ;;  %v52_v11 = vld [vmem:[%s465_s2 + $0x18] sm:$0xff]  ;;  %v50_v12 = vld [vmem:[%s465_s2 + $0x8] sm:$0xff] }
   0x5   :  { %v318_v13 = vld [vmem:[%s464_s1 + $0x18] sm:$0xff]  ;;  %v323_v14 = vld [vmem:[%s464_s1 + $0x40] sm:$0xff]  ;;  %v313_v15 = vld [vmem:[%s466_s0 + $0x14] sm:$0xf] }
   0x6   :  { %177 = vmatpush.bf16.msra.mxu0 %v321_v2  ;;  %329 = vmatpush.bf16.msra.mxu2 %v321_v2  ;;  %v253_v16 = vld [vmem:[%s466_s0 + $0x18] sm:$0xf0]  ;;  %v311_v17 = vld [vmem:[%s466_s0 + $0x4] sm:$0xf]  ;;  %v245_v18 = vld [vmem:[%s466_s0 + $0x8] sm:$0xf0] }
   0x7   :  { %337 = vmatpush.bf16.msra.mxu3 %v326_v3  ;;  %199 = vmatpush.bf16.msra.mxu1 %v326_v3  ;;  %v317_v19 = vld [vmem:[%s464_s1 + $0x10] sm:$0xff]  ;;  %v256_v20 = vor.u32 %v313_v15, %v253_v16  ;;  %v248_v21 = vor.u32 %v311_v17, %v245_v18  ;;  %v316_v22 = vld [vmem:[%s464_s1 + $0x8] sm:$0xff]  ;;  %v315_v23 = vld [vmem:[%s464_s1] sm:$0xff] }
   0x8   :  { %v243_v24 = vld [vmem:[%s466_s0] sm:$0xf]  ;;  %v312_v25 = vld [vmem:[%s466_s0 + $0x4] sm:$0xf0]  ;;  %v251_v26 = vld [vmem:[%s466_s0 + $0x10] sm:$0xf] }
   0x9   :  { %v314_v27 = vld [vmem:[%s466_s0 + $0x14] sm:$0xf0]  ;;  %v244_v28 = vor.u32 %v312_v25, %v243_v24 }
   0xa   :  { %178 = vmatpush.bf16.msra.mxu0 %v320_v5  ;;  %330 = vmatpush.bf16.msra.mxu2 %v320_v5  ;;  %v252_v29 = vor.u32 %v314_v27, %v251_v26 }
   0xb   :  { %338 = vmatpush.bf16.msra.mxu3 %v325_v6  ;;  %200 = vmatpush.bf16.msra.mxu1 %v325_v6 }
   0xc   :  { %70 = vperm.xlu1 %343, %v52_v11   ;;  %60 = vperm.xlu0 %342, %v50_v12  }
   0xe   :  { %179 = vmatpush.bf16.msra.mxu0 %v319_v9  ;;  %331 = vmatpush.bf16.msra.mxu2 %v319_v9 }
   0xf   :  { %339 = vmatpush.bf16.msra.mxu3 %v324_v10  ;;  %201 = vmatpush.bf16.msra.mxu1 %v324_v10 }
  0x12   :  { %180 = vmatpush.bf16.msra.mxu0 %v318_v13  ;;  %332 = vmatpush.bf16.msra.mxu2 %v318_v13 }
  0x13   :  { %340 = vmatpush.bf16.msra.mxu3 %v323_v14  ;;  %202 = vmatpush.bf16.msra.mxu1 %v323_v14 }
  0x16   :  { %181 = vmatpush.bf16.msra.mxu0 %v317_v19  ;;  %333 = vmatpush.bf16.msra.mxu2 %v317_v19 }
  0x17   :  { %310 = vmatmul.msk.bf16.vlgmr.msra.gmra.mxu3 %vm169_vm0, %v256_v20  ;;  %309 = vmatmul.msk.bf16.vlgmr.msra.gmra.mxu1 %vm169_vm0, %v248_v21 }
  0x1a   :  { %182 = vmatpush.bf16.msra.mxu0 %v316_v22  ;;  %334 = vmatpush.bf16.msra.mxu2 %v316_v22 }
  0x1e   :  { %183 = vmatpush.bf16.msra.mxu0 %v315_v23  ;;  %335 = vmatpush.bf16.msra.mxu2 %v315_v23 }
  0x21   :  { %184 = vmatmul.bf16.vlgmr.msra.gmra.mxu0 %v244_v28  ;;  %189 = vmatmul.bf16.vlgmr.msra.gmra.mxu2 %v252_v29 }
  0x76   :  { %v56_v30 = vpop.permute.xlu0 %55  ;;  %v66_v36 = vpop.permute.xlu1 %65 }
  0x7e   :  { %v61_v43 = vpop.permute.xlu0 %60  ;;  %v71_v52 = vpop.permute.xlu1 %70 }
  0x94   :  { %v204_v32 = vpop.f32.mrf.mxu1 }
  0x9a   :  { %v209_v38 = vpop.f32.mrf.mxu3 }
  0x9c   :  { %v206_v47 = vpop.f32.mrf.mxu1 }
  0x9e   :  { %v185_v31 = vpop.f32.mrf.mxu0 }
  0x9f   :  { %v186_v33 = vadd.f32 %v185_v31, %v56_v30 }
  0xa1   :  { %v205_v35 = vadd.f32 %v204_v32, %v186_v33 }
  0xa2   :  { %v211_v58 = vpop.f32.mrf.mxu3 }
  0xa3   :  { %vm215_vm1 = vcmp.ge.f32.partialorder %v205_v35, 0.0  ;;  %v220_v37 = vmul.f32 %v219_v34, %v205_v35 }
  0xa4   :  { %v190_v39 = vpop.f32.mrf.mxu2 }
  0xa5   :  { %v224_v40 = vsel %vm215_vm1, %v205_v35, %v220_v37  ;;  %v191_v41 = vadd.f32 %v190_v39, %v66_v36 }
  0xa6   :  { %v228_v42 = vpack.c.bf16 %v224_v40, %v224_v40  ;;  %v187_v44 = vpop.f32.mrf.mxu0 }
  0xa7   :  { %v210_v45 = vadd.f32 %v209_v38, %v191_v41  ;;  %v188_v46 = vadd.f32 %v187_v44, %v61_v43 }
  0xa8   :  { %233 = vst.msk [vmem:[%s468_s4] sm:$0xf] %vm232_vm2, %v228_v42 }
  0xa9   :  { %vm217_vm3 = vcmp.ge.f32.partialorder %v210_v45, 0.0  ;;  %v222_v48 = vmul.f32 %v219_v34, %v210_v45  ;;  %v207_v49 = vadd.f32 %v206_v47, %v188_v46 }
  0xab   :  { %v226_v50 = vsel %vm217_vm3, %v210_v45, %v222_v48  ;;  %vm216_vm4 = vcmp.ge.f32.partialorder %v207_v49, 0.0  ;;  %v221_v51 = vmul.f32 %v219_v34, %v207_v49 }
  0xac   :  { %v230_v53 = vpack.c.bf16 %v226_v50, %v226_v50  ;;  %v192_v54 = vpop.f32.mrf.mxu2 }
  0xad   :  { %v225_v55 = vsel %vm216_vm4, %v207_v49, %v221_v51  ;;  %v193_v56 = vadd.f32 %v192_v54, %v71_v52 }
  0xae   :  { %235 = vst.msk [vmem:[%s468_s4 + $0x8] sm:$0xf] %vm232_vm2, %v230_v53  ;;  %v229_v57 = vpack.c.bf16 %v225_v55, %v225_v55 }
  0xaf   :  { %v212_v59 = vadd.f32 %v211_v58, %v193_v56 }
  0xb0   :  { %234 = vst.msk [vmem:[%s468_s4 + $0x4] sm:$0xf] %vm232_vm2, %v229_v57 }
  0xb1   :  { %vm218_vm5 = vcmp.ge.f32.partialorder %v212_v59, 0.0  ;;  %v223_v60 = vmul.f32 %v219_v34, %v212_v59 }
  0xb3   :  { %v227_v61 = vsel %vm218_vm5, %v212_v59, %v223_v60 }
  0xb4   :  { %v231_v62 = vpack.c.bf16 %v227_v61, %v227_v61 }
  0xb6   :  { %236 = vst.msk [vmem:[%s468_s4 + $0xc] sm:$0xf] %vm232_vm2, %v231_v62 }

// kernel: autoencoder_forward.18
= control target key start
LH: loop header
LB: loop body
LE: loop exit
PB: predicated region body
PF: predicated region fallthrough
CT: control target
= control target key end

     0   :  { %s779_s17 = smov 0   ;;  %s781_s18 = smov 0   ;;  %s854_s0 = inlined_call_operand.vmem [shape: bf16[4,16,288], index: 0, kind: input, shape index: {}]   ;;  %s855_s1 = inlined_call_operand.vmem [shape: bf16[4,288,32], index: 1, kind: input, shape index: {}]   ;;  %s856_s2 = inlined_call_operand.vmem [shape: f32[16,1], index: 2, kind: input, shape index: {}]   ;;  %s857_s3 = inlined_call_operand.<no memory space> [shape: f32[1], index: 3, kind: input, shape index: {}]   ;;  %s858_s4 = inlined_call_operand.vmem [shape: bf16[4,16,32], index: 4, kind: output, shape index: {}]  }
   0x1   :  { %9 = sst [smem:[#allocation2]] %s857_s3  ;;  %s783_s19 = smov 0  }
   0x2 LB: > { %s27_s3 = sadd.s32 1, %s744_s18  ;;  %p584_p0 = scmp.ge.s32.totalorder %s748_s19, 1  ;;  %s748_s19 = sphi %s783_s19, %s15_s19   ;;  %s744_s18 = sphi %s781_s18, %s860_s18   ;;  %s740_s17 = sphi %s779_s17, %s859_s17  }
   0x3   : > { %p29_p1 = scmp.ge.s32.totalorder %s27_s3, 4  ;;  %p192_p2 = scmp.lt.s32.totalorder %s748_s19, 5 }
   0x5   : > { %s862_s3 = smov (%p29_p1, %s27_s3), 0  ;;  %p193_p3 = pnand %p584_p0, %p192_p2 }
   0x6   : > { %p229_p4 = scmp.lt.s32.totalorder (!%p193_p3), %s740_s17, 3  ;;  %s472_s6 = sld [smem:[#allocation2]] (!%p193_p3) }
   0x7   : > { %196 = sbr.rel (%p193_p3) target bundleno = 194 (0xc2), region = 36 }
   0xc   : > { %s864_s17 = smov (!%p229_p4, %s740_s17), 3  ;;  %v750_v5 = vmov 0   ;;  %vm426_vm0 = vcmask 261120   ;;  %v291_v12 = vld [vmem:[%s856_s2] sm:$0xff]  ;;  %v292_v17 = vld [vmem:[%s856_s2 + $0x8] sm:$0xff]  ;;  %v475_v36 = vstv %s472_s6  ;;  %vm482_vm2 = vcmask 257024  }
   0xd   : > { %s699_s20 = smul.u32 144, %s864_s17  ;;  %725 = vset.pattern.permute.xlu0 %v750_v5  ;;  %s676_s7 = sshll.u32 %s864_s17, 3 }
   0xe   : > { %s698_s21 = smul.u32 24, %s864_s17  ;;  %295 = vperm.xlu0 %725, %v291_v12   ;;  %s249_s10 = scalar_lea.vmem %s858_s4, %s676_s7 }
   0xf   : > { %s804_s24 = scalar_lea.vmem %s855_s1, %s699_s20 }
  0x10   : > { %v687_v0 = vld [vmem:[%s804_s24 + $0x38] sm:$0xff]  ;;  %s811_s27 = scalar_lea.vmem %s854_s0, %s698_s21  ;;  %v686_v2 = vld [vmem:[%s804_s24 + $0x30] sm:$0xff]  ;;  %v697_v4 = vld [vmem:[%s804_s24 + $0x88] sm:$0xff] }
  0x11   : > { %v695_v1 = vld [vmem:[%s804_s24 + $0x78] sm:$0xff]  ;;  %430 = vmatpush.bf16.msra.mxu0 %v687_v0  ;;  %v694_v3 = vld [vmem:[%s804_s24 + $0x70] sm:$0xff]  ;;  %464 = vmatpush.bf16.msra.mxu2 %v697_v4  ;;  %v696_v6 = vld [vmem:[%s804_s24 + $0x80] sm:$0xff] }
  0x12   : > { %444 = vmatpush.bf16.msra.mxu1 %v695_v1  ;;  %v599_v7 = vld [vmem:[%s811_s27 + $0x8] sm:$0xf]  ;;  %v679_v8 = vld [vmem:[%s811_s27 + $0x10] sm:$0xf0]  ;;  %v684_v13 = vld [vmem:[%s804_s24 + $0x20] sm:$0xff] }
  0x13   : > { %v685_v9 = vld [vmem:[%s804_s24 + $0x28] sm:$0xff]  ;;  %v600_v11 = vor.u32 %v679_v8, %v599_v7  ;;  %v692_v14 = vld [vmem:[%s804_s24 + $0x60] sm:$0xff]  ;;  %v683_v15 = vld [vmem:[%s804_s24 + $0x18] sm:$0xff] }
  0x14   : > { %v693_v10 = vld [vmem:[%s804_s24 + $0x68] sm:$0xff]  ;;  %v691_v16 = vld [vmem:[%s804_s24 + $0x58] sm:$0xff]  ;;  %v682_v18 = vld [vmem:[%s804_s24 + $0x10] sm:$0xff] }
  0x15   : > { %431 = vmatpush.bf16.msra.mxu0 %v686_v2  ;;  %465 = vmatpush.bf16.msra.mxu2 %v696_v6  ;;  %v690_v19 = vld [vmem:[%s804_s24 + $0x50] sm:$0xff]  ;;  %v681_v20 = vld [vmem:[%s804_s24 + $0x8] sm:$0xff]  ;;  %v680_v22 = vld [vmem:[%s804_s24] sm:$0xff] }
  0x16   : > { %445 = vmatpush.bf16.msra.mxu1 %v694_v3  ;;  %300 = vperm.xlu0 %725, %v292_v17   ;;  %v689_v21 = vld [vmem:[%s804_s24 + $0x48] sm:$0xff]  ;;  %v688_v23 = vld [vmem:[%s804_s24 + $0x40] sm:$0xff]  ;;  %v593_v27 = vld [vmem:[%s811_s27 + $0xc] sm:$0xf0] }
  0x17   : > { %v591_v24 = vld [vmem:[%s811_s27] sm:$0xf]  ;;  %v678_v25 = vld [vmem:[%s811_s27 + $0x8] sm:$0xf0]  ;;  %v677_v26 = vld [vmem:[%s811_s27 + $0x4] sm:$0xf] }
  0x18   : > { %673 = vmatmul.msk.bf16.vlgmr.msra.gmra.mxu2 %vm426_vm0, %v600_v11  ;;  %v592_v28 = vor.u32 %v678_v25, %v591_v24  ;;  %v596_v29 = vor.u32 %v677_v26, %v593_v27 }
  0x19   : > { %432 = vmatpush.bf16.msra.mxu0 %v685_v9 }
  0x1a   : > { %446 = vmatpush.bf16.msra.mxu1 %v693_v10 }
  0x1d   : > { %433 = vmatpush.bf16.msra.mxu0 %v684_v13 }
  0x1e   : > { %447 = vmatpush.bf16.msra.mxu1 %v692_v14 }
  0x21   : > { %434 = vmatpush.bf16.msra.mxu0 %v683_v15 }
  0x22   : > { %448 = vmatpush.bf16.msra.mxu1 %v691_v16 }
  0x25   : > { %435 = vmatpush.bf16.msra.mxu0 %v682_v18 }
  0x26   : > { %449 = vmatpush.bf16.msra.mxu1 %v690_v19 }
  0x29   : > { %436 = vmatpush.bf16.msra.mxu0 %v681_v20 }
  0x2a   : > { %450 = vmatpush.bf16.msra.mxu1 %v689_v21 }
  0x2d   : > { %437 = vmatpush.bf16.msra.mxu0 %v680_v22 }
  0x2e   : > { %451 = vmatpush.bf16.msra.mxu1 %v688_v23 }
  0x30   : > { %438 = vmatmul.bf16.vlgmr.msra.gmra.mxu0 %v592_v28 }
  0x31   : > { %452 = vmatmul.bf16.vlgmr.msra.gmra.mxu1 %v596_v29 }
  0x80   : > { %v296_v30 = vpop.permute.xlu0 %295 }
  0x88   : > { %v301_v39 = vpop.permute.xlu0 %300 }
  0x9b   : > { %v467_v34 = vpop.f32.mrf.mxu2 }
  0xa3   : > { %v469_v46 = vpop.f32.mrf.mxu2 }
  0xad   : > { %v439_v31 = vpop.f32.mrf.mxu0 }
  0xae   : > { %v453_v32 = vpop.f32.mrf.mxu1  ;;  %v440_v33 = vadd.f32 %v439_v31, %v296_v30 }
  0xb0   : > { %v454_v35 = vadd.f32 %v453_v32, %v440_v33 }
  0xb2   : > { %v468_v37 = vadd.f32 %v467_v34, %v454_v35 }
  0xb4   : > { %vm473_vm1 = vcmp.ge.f32.partialorder %v468_v37, 0.0  ;;  %v476_v38 = vmul.f32 %v475_v36, %v468_v37 }
  0xb5   : > { %v441_v40 = vpop.f32.mrf.mxu0 }
  0xb6   : > { %v478_v41 = vsel %vm473_vm1, %v468_v37, %v476_v38  ;;  %v442_v42 = vadd.f32 %v441_v40, %v301_v39  ;;  %v455_v44 = vpop.f32.mrf.mxu1 }
  0xb7   : > { %v480_v43 = vpack.c.bf16 %v478_v41, %v478_v41 }
  0xb8   : > { %v456_v45 = vadd.f32 %v455_v44, %v442_v42 }
  0xb9   : > { %483 = vst.msk [vmem:[%s249_s10] sm:$0xf] %vm482_vm2, %v480_v43 }
  0xba   : > { %v470_v47 = vadd.f32 %v469_v46, %v456_v45 }
  0xbc   : > { %vm474_vm3 = vcmp.ge.f32.partialorder %v470_v47, 0.0  ;;  %v477_v48 = vmul.f32 %v475_v36, %v470_v47 }
  0xbe   : > { %v479_v49 = vsel %vm474_vm3, %v470_v47, %v477_v48 }
  0xbf   : > { %v481_v50 = vpack.c.bf16 %v479_v49, %v479_v49 }
  0xc1   : > { %484 = vst.msk [vmem:[%s249_s10 + $0x4] sm:$0xf] %vm482_vm2, %v481_v50 }
  0xc2 PF: > { %s15_s19 = sadd.s32 1, %s748_s19   ;;  %s859_s17 = smov %s744_s18 }
  0xc3   : > { %p12_p5 = scmp.ge.s32.totalorder %s15_s19, 6   ;;  %s860_s18 = smov %s862_s3 }
  0xc5   :  { %14 = sbr.rel (!%p12_p5) target bundleno = 2 (0x2), region = 69 }

// kernel: autoencoder_forward.19
= control target key start
LH: loop header
LB: loop body
LE: loop exit
PB: predicated region body
PF: predicated region fallthrough
CT: control target
= control target key end

     0   :  { %s611_s15 = smov 0   ;;  %s613_s16 = smov 0   ;;  %s658_s0 = inlined_call_operand.vmem [shape: bf16[4,3,144], index: 0, kind: input, shape index: {}]   ;;  %s659_s1 = inlined_call_operand.vmem [shape: bf16[4,144,128], index: 1, kind: input, shape index: {}]   ;;  %s660_s2 = inlined_call_operand.vmem [shape: f32[3,1], index: 2, kind: input, shape index: {}]   ;;  %s661_s3 = inlined_call_operand.<no memory space> [shape: f32[1], index: 3, kind: input, shape index: {}]   ;;  %s662_s4 = inlined_call_operand.vmem [shape: f32[4,3,128], index: 4, kind: output, shape index: {}]  }
   0x1   :  { %s615_s17 = smov 0  }
   0x2 LB: > { %s27_s3 = sadd.s32 1, %s579_s16  ;;  %p475_p0 = scmp.ge.s32.totalorder %s583_s17, 1  ;;  %s583_s17 = sphi %s615_s17, %s15_s17   ;;  %s579_s16 = sphi %s613_s16, %s664_s16   ;;  %s575_s15 = sphi %s611_s15, %s663_s15  }
   0x3   : > { %p29_p1 = scmp.ge.s32.totalorder %s27_s3, 4  ;;  %p192_p2 = scmp.lt.s32.totalorder %s583_s17, 5 }
   0x5   : > { %s666_s3 = smov (%p29_p1, %s27_s3), 0  ;;  %p193_p3 = pnand %p475_p0, %p192_p2 }
   0x6   : > { %p228_p4 = scmp.lt.s32.totalorder (!%p193_p3), %s575_s15, 3 }
   0x7   : > { %196 = sbr.rel (%p193_p3) target bundleno = 207 (0xcf), region = 36 }
   0xc   : > { %s668_s15 = smov (!%p228_p4, %s575_s15), 3  ;;  %v585_v4 = vmov 0   ;;  %v268_v5 = vld [vmem:[%s660_s2] sm:$0x7]  ;;  %vm333_vm0 = vcmask 130048  }
   0xd   : > { %s530_s18 = smul.u32 72, %s668_s15  ;;  %s520_s19 = sshll.u32 %s668_s15, 2  ;;  %556 = vset.pattern.permute.xlu0 %v585_v4 }
   0xe   : > { %s232_s22 = scalar_lea.vmem %s658_s0, %s520_s19  ;;  %271 = vperm.xlu0 %556, %v268_v5   ;;  %s247_s30 = scalar_lea.vmem %s662_s4, %s520_s19 }
   0xf   : > { %s240_s25 = scalar_lea.vmem %s659_s1, %s530_s18  ;;  %v249_v0 = vld [vmem:[%s232_s22] sm:$0xf] }
  0x10   : > { %v528_v1 = vld [vmem:[%s240_s25 + $0x38] sm:$0xff]  ;;  %275 = vst [vmem:[#allocation1] ss:$4 sm:$0xff] %v249_v0  ;;  %v527_v2 = vld [vmem:[%s240_s25 + $0x30] sm:$0xff]  ;;  %v529_v3 = vld [vmem:[%s240_s25 + $0x40] sm:$0xff] }
  0x11   : > { %336 = vmatpush.bf16.msra.mxu0 %v528_v1  ;;  %356 = vmatpush.bf16.msra.mxu1 %v529_v3  ;;  %v526_v6 = vld [vmem:[%s240_s25 + $0x28] sm:$0xff]  ;;  %v525_v8 = vld [vmem:[%s240_s25 + $0x20] sm:$0xff]  ;;  %v524_v9 = vld [vmem:[%s240_s25 + $0x18] sm:$0xff] }
  0x12   : > { %v523_v10 = vld [vmem:[%s240_s25 + $0x10] sm:$0xff]  ;;  %v522_v11 = vld [vmem:[%s240_s25 + $0x8] sm:$0xff]  ;;  %v521_v12 = vld [vmem:[%s240_s25] sm:$0xff] }
  0x15   : > { %337 = vmatpush.bf16.msra.mxu0 %v527_v2 }
  0x17   : > { %v277_v7 = vld.sshfl [vmem:[#allocation1 + $0x8] sm:$0xff pattern:$0x73625140]  ;;  %v276_v13 = vld.sshfl [vmem:[#allocation1] sm:$0xff pattern:$0x73625140] }
  0x18   : > { %516 = vmatmul.msk.bf16.vlgmr.msra.gmra.mxu1 %vm333_vm0, %v277_v7 }
  0x19   : > { %338 = vmatpush.bf16.msra.mxu0 %v526_v6 }
  0x1d   : > { %339 = vmatpush.bf16.msra.mxu0 %v525_v8 }
  0x21   : > { %340 = vmatpush.bf16.msra.mxu0 %v524_v9 }
  0x25   : > { %341 = vmatpush.bf16.msra.mxu0 %v523_v10 }
  0x29   : > { %342 = vmatpush.bf16.msra.mxu0 %v522_v11 }
  0x2d   : > { %343 = vmatpush.bf16.msra.mxu0 %v521_v12 }
  0x30   : > { %344 = vmatmul.bf16.vlgmr.msra.gmra.mxu0 %v276_v13 }
  0x80   : > { %v272_v16 = vpop.permute.xlu0 %271 }
  0x95   : > { %v358_v14 = vpop.f32.mrf.mxu1 }
  0x9d   : > { %v360_v15 = vpop.f32.mrf.mxu1 }
  0xad   : > { %v345_v17 = vpop.f32.mrf.mxu0 }
  0xae   : > { %v346_v18 = vadd.f32 %v345_v17, %v272_v16 }
  0xb0   : > { %v359_v19 = vadd.f32 %v358_v14, %v346_v18 }
  0xb2   : > { %v517_v20 = vmul.f32 -1.442695, %v359_v19 }
  0xb4   : > { %557 = vpow2.f32 %v517_v20 }
  0xb5   : > { %v347_v21 = vpop.f32.mrf.mxu0 }
  0xba   : > { %v558_v22 = vpop.eup %557 }
  0xbb   : > { %v365_v23 = vadd.f32 1.0, %v558_v22 }
  0xbd   : > { %559 = vrcp.f32 %v365_v23  ;;  %v377_v27 = vand.u32 2147483648, %v365_v23  ;;  %v375_v29 = vand.u32 2147483647, %v365_v23  ;;  %vm371_vm2 = vweird.f32 %v365_v23 }
  0xbf   : > { %v378_v31 = vor.u32 1.1754944e-38, %v377_v27  ;;  %vm376_vm4 = vcmp.eq.f32.partialorder %v375_v29, 8.507059e+37 }
  0xc3   : > { %v560_v24 = vpop.eup %559 }
  0xc4   : > { %v367_v25 = vmul.f32 %v560_v24, %v365_v23  ;;  %vm372_vm1 = vweird.f32 %v560_v24 }
  0xc5   : > { %vm373_vm3 = vmor %vm371_vm2, %vm372_vm1 }
  0xc6   : > { %v368_v26 = vsub.f32 1.0, %v367_v25 }
  0xc8   : > { %v369_v28 = vmul.f32 %v560_v24, %v368_v26 }
  0xca   : > { %v370_v30 = vadd.f32 %v560_v24, %v369_v28 }
  0xcc   : > { %v374_v32 = vsel %vm373_vm3, %v560_v24, %v370_v30 }
  0xcd   : > { %v379_v33 = vsel %vm376_vm4, %v378_v31, %v374_v32 }
  0xce   : > { %381 = vst [vmem:[%s247_s30] sm:$0x7] %v379_v33 }
  0xcf PF: > { %s15_s17 = sadd.s32 1, %s583_s17   ;;  %s663_s15 = smov %s579_s16 }
  0xd0   : > { %p12_p5 = scmp.ge.s32.totalorder %s15_s17, 6   ;;  %s664_s16 = smov %s666_s3 }
  0xd2   :  { %14 = sbr.rel (!%p12_p5) target bundleno = 2 (0x2), region = 69 }

</bundles_post_ra>
